<compile_context>
chip_gen: v7x
topology: tpu7x:2x2x1
jax: 0.10.0
libtpu: 0.0.40
codegen_flags: <defaults>
</compile_context>

<pallas_src>
import jax
import jax.numpy as jnp
from jax.experimental import pallas as pl
from jax.experimental.pallas import tpu as pltpu

# ---- static problem sizes (small, VMEM-resident) ----
NU = 8          # num user nodes
NP = 8          # num product nodes
N = NU + NP     # total nodes per graph
FU = 16         # user_feature_dim
FP = 8          # product_feature_dim
HID = 32        # hidden_dim
E = 16          # number of (user -> product) edges per graph

G = 8           # graphs per grid step  (G*N = 128 rows = full MXU pass height)
GN = G * N      # 128
GE = G * E      # 128 edges per step -> lane-dense (1, 128) output row
TWO_GE = 2 * GE # 256 gather rows (user endpoints then product endpoints)

NEG_SLOPE = 0.2        # GATConv default negative_slope
L2_EPS = 1e-12         # F.normalize default eps

# ---- packed parameter slab layout (rows of width HID, sublane-aligned blocks) ----
F_IN = FU + FP + 2       # 26: [user feats | product feats | is_user | is_product]
R_WFEAT = 0              # rows 0..25: [Wu; Wp; bu; bp]  (biases folded into the matmul)
R_WG = 32                # (HID, HID) GAT linear
R_WC = R_WG + HID        # (HID, HID) GCN linear
R_W1 = R_WC + HID        # (HID, HID) predictor hidden
R_BIAS = R_W1 + HID      # 16-row bias/vector block (aligned)
P_ROWS = R_BIAS + 16     # = 144 total rows
# rows inside the bias block:
I_BG, I_AS, I_AD, I_BC, I_B1, I_W2, I_B2 = range(7)


def gat_model_kernel(feat_ref,      # (GN, F_IN)  packed node features (+ indicator cols)
                     adj_ref,       # (GN, GN)    block-diagonal symmetric adj + self loops
                     idx_ref,       # (TWO_GE, 1) int32 gather rows into x_gcn
                     prm_ref,       # (P_ROWS, HID) packed parameter slab (shared)
                     out_ref):      # (1, GE)     lane-dense predictions for this step
    f32 = jnp.float32

    # ---- static, sublane-aligned views into the packed parameter slab ----
    W_feat = prm_ref[R_WFEAT:R_WFEAT + F_IN, :]              # [Wu; Wp; bu; bp]
    Wg = prm_ref[R_WG:R_WG + HID, :]
    Wc = prm_ref[R_WC:R_WC + HID, :]
    W1 = prm_ref[R_W1:R_W1 + HID, :]
    bg = prm_ref[R_BIAS + I_BG:R_BIAS + I_BG + 1, :]
    att_src = prm_ref[R_BIAS + I_AS:R_BIAS + I_AS + 1, :]
    att_dst = prm_ref[R_BIAS + I_AD:R_BIAS + I_AD + 1, :]
    bc = prm_ref[R_BIAS + I_BC:R_BIAS + I_BC + 1, :]
    b1 = prm_ref[R_BIAS + I_B1:R_BIAS + I_B1 + 1, :]
    w2_row = prm_ref[R_BIAS + I_W2:R_BIAS + I_W2 + 1, :]     # W2^T as a (1, HID) row
    b2 = prm_ref[R_BIAS + I_B2:R_BIAS + I_B2 + 1, 0:1]       # (1, 1) scalar

    adj = adj_ref[...]                                       # (GN, GN)

    # ---- fused feature transform (biases folded via indicator columns) ----
    x = jnp.dot(feat_ref[...], W_feat, preferred_element_type=f32)        # (GN, HID)

    # ---- GATConv (heads=1, self loops in adj), batched over G graphs via block-diag adj ----
    h = jnp.dot(x, Wg, preferred_element_type=f32)                        # (GN, HID)
    a_dst = jnp.sum(h * att_dst, axis=-1, keepdims=True)                  # (GN, 1)  VPU reduce
    a_src_row = jax.lax.dot_general(att_src, h, (((1,), (1,)), ((), ())),
                                    preferred_element_type=f32)           # (1, GN)
    scores = a_dst + a_src_row                          # scores[i, j] = dst_i + src_j
    scores = jnp.where(scores > 0, scores, NEG_SLOPE * scores)            # leaky_relu
    masked = jnp.where(adj > 0, scores, f32(-1e30))
    m = jnp.max(masked, axis=-1, keepdims=True)
    p = jnp.exp(masked - m) * adj                       # masked softmax over source nodes j
    alpha = p / jnp.sum(p, axis=-1, keepdims=True)
    x_gat = jnp.maximum(jnp.dot(alpha, h, preferred_element_type=f32) + bg, 0.0)
    # TODO(synk): training-mode dropout (pltpu.prng_*) not implemented; eval semantics only.

    # ---- GCNConv: D^-1/2 (A (D^-1/2 h2)); adj symmetric, self loops => deg >= 1 ----
    h2 = jnp.dot(x_gat, Wc, preferred_element_type=f32)                   # (GN, HID)
    deg = jnp.sum(adj, axis=-1, keepdims=True)                            # (GN, 1)
    dis = jax.lax.rsqrt(deg)
    x_gcn = dis * jnp.dot(adj, dis * h2, preferred_element_type=f32) + bc

    # ---- per-edge gather as ONE one-hot MXU matmul (no scalar loop, no VMEM scratch) ----
    idx = idx_ref[...]                                                    # (TWO_GE, 1) int32
    cols = jax.lax.broadcasted_iota(jnp.int32, (TWO_GE, GN), 1)
    onehot = (cols == idx).astype(f32)                                    # (TWO_GE, GN)
    emb = jnp.dot(onehot, x_gcn, preferred_element_type=f32)              # (TWO_GE, HID)
    u_emb = emb[0:GE, :]                                                  # (GE, HID)
    p_emb = emb[GE:TWO_GE, :]                                             # (GE, HID)

    # ---- L2-normalize, elementwise product, predictor MLP ----
    u_n = u_emb / jnp.maximum(jnp.sqrt(jnp.sum(u_emb * u_emb, axis=-1, keepdims=True)), L2_EPS)
    p_n = p_emb / jnp.maximum(jnp.sqrt(jnp.sum(p_emb * p_emb, axis=-1, keepdims=True)), L2_EPS)
    d = u_n * p_n

    hdn = jnp.maximum(jnp.dot(d, W1, preferred_element_type=f32) + b1, 0.0)  # (GE, HID)
    # final HID -> 1 layer as a (1,HID)x(GE,HID) contraction => lane-dense (1, GE) row store
    out_ref[...] = jax.lax.dot_general(w2_row, hdn, (((1,), (1,)), ((), ())),
                                       preferred_element_type=f32) + b2


# ------------------------------ wrapper-side glue ------------------------------

def _dense_adjacency(edge_index):
    """Dense symmetric adjacency (bidirectional edges) + self loops for one graph."""
    src = jnp.concatenate([edge_index[0], edge_index[1]])
    dst = jnp.concatenate([edge_index[1], edge_index[0]])
    adj = jnp.zeros((N, N), jnp.float32).at[dst, src].set(1.0)
    return adj + jnp.eye(N, dtype=jnp.float32)


def _group_blockdiag_adj(ei_group):
    """(G, 2, E) edge indices -> (GN, GN) block-diagonal adjacency for one grid step."""
    adj_g = jax.vmap(_dense_adjacency)(ei_group)                          # (G, N, N)
    bd = jnp.einsum('gh,gij->gihj', jnp.eye(G, dtype=jnp.float32), adj_g)
    return bd.reshape(GN, GN)


def _group_gather_idx(ei_group):
    """(G, 2, E) edge indices -> (2GE, 1) int32 row indices into the (GN, HID) node block."""
    offs = (jnp.arange(G, dtype=jnp.int32) * N)[:, None]                  # (G, 1)
    u = (ei_group[:, 0, :].astype(jnp.int32) + offs).reshape(-1)          # (GE,)
    p = (ei_group[:, 1, :].astype(jnp.int32) + offs).reshape(-1)          # (GE,)
    return jnp.concatenate([u, p])[:, None]                               # (2GE, 1)


def _pack_params(p):
    """Collapse all weights/biases into one (P_ROWS, HID) f32 slab (single shared operand)."""
    w_feat = jnp.concatenate([p["Wu"], p["Wp"], p["bu"], p["bp"]], axis=0)    # (26, HID)
    w_feat = jnp.pad(w_feat, ((0, R_WG - F_IN), (0, 0)))                      # pad to 32 rows
    b2_row = jnp.zeros((1, HID), jnp.float32).at[0, 0].set(p["b2"][0, 0])
    bias_blk = jnp.concatenate(
        [p["bg"], p["att_src"], p["att_dst"], p["bc"], p["b1"],
         p["W2"].T, b2_row, jnp.zeros((16 - 7, HID), jnp.float32)], axis=0)    # (16, HID)
    slab = jnp.concatenate([w_feat, p["Wg"], p["Wc"], p["W1"], bias_blk], axis=0)
    assert slab.shape == (P_ROWS, HID)
    return slab


def _cost_estimate(num_steps):
    mm = 2 * (GN * F_IN * HID          # fused feature transform
              + GN * HID * HID         # GAT linear
              + GN * HID               # att_src row
              + GN * GN * HID          # alpha @ h
              + GN * HID * HID         # GCN linear
              + GN * GN * HID          # adj @ (dis * h2)
              + TWO_GE * GN * HID      # one-hot gather matmul
              + GE * HID * HID         # predictor hidden
              + GE * HID)              # predictor output row
    vpu = 12 * GN * GN + 20 * GN * HID + TWO_GE * GN + 10 * GE * HID
    trans = GN * GN + GN + TWO_GE      # exp, rsqrt, sqrt
    bytes_per_step = 4 * (GN * F_IN + GN * GN + TWO_GE + GE)
    bytes_fixed = 4 * P_ROWS * HID
    return pl.CostEstimate(flops=int(num_steps * (mm + vpu)),
                           transcendentals=int(num_steps * trans),
                           bytes_accessed=int(num_steps * bytes_per_step + bytes_fixed))


@jax.jit
def gat_model_forward_batched(edge_index_b, user_features_b, product_features_b, params):
    """Batched forward: edge_index_b (B, 2, E) with GLOBAL node ids -> (B, E) predictions.

    One pallas_call; G graphs per grid step (block-diagonal batching).  B is zero-padded to a
    multiple of G and the padded graphs' outputs are discarded.
    """
    B = user_features_b.shape[0]
    S = -(-B // G)                     # grid steps
    Bp = S * G
    pad = Bp - B

    uf = jnp.pad(user_features_b, ((0, pad), (0, 0), (0, 0)))
    pf = jnp.pad(product_features_b, ((0, pad), (0, 0), (0, 0)))
    ei = jnp.pad(edge_index_b.astype(jnp.int32), ((0, pad), (0, 0), (0, 0)))

    # packed node features: user rows [uf, 0, 1, 0], product rows [0, pf, 0, 1]
    feat_u = jnp.concatenate(
        [uf, jnp.zeros((Bp, NU, FP), jnp.float32),
         jnp.ones((Bp, NU, 1), jnp.float32), jnp.zeros((Bp, NU, 1), jnp.float32)], axis=-1)
    feat_p = jnp.concatenate(
        [jnp.zeros((Bp, NP, FU), jnp.float32), pf,
         jnp.zeros((Bp, NP, 1), jnp.float32), jnp.ones((Bp, NP, 1), jnp.float32)], axis=-1)
    feat = jnp.concatenate([feat_u, feat_p], axis=1).reshape(S, GN, F_IN)    # (S, GN, F_IN)

    ei_grp = ei.reshape(S, G, 2, E)
    adj = jax.vmap(_group_blockdiag_adj)(ei_grp)                             # (S, GN, GN)
    gidx = jax.vmap(_group_gather_idx)(ei_grp)                               # (S, 2GE, 1)
    prm = _pack_params(params)                                               # (P_ROWS, HID)

    out = pl.pallas_call(
        gat_model_kernel,
        out_shape=jax.ShapeDtypeStruct((S, 1, GE), jnp.float32),
        grid_spec=pltpu.PrefetchScalarGridSpec(
            num_scalar_prefetch=0,
            grid=(S,),
            in_specs=[
                pl.BlockSpec((None, GN, F_IN), lambda s: (s, 0, 0)),     # packed features
                pl.BlockSpec((None, GN, GN), lambda s: (s, 0, 0)),       # block-diag adjacency
                pl.BlockSpec((None, TWO_GE, 1), lambda s: (s, 0, 0)),    # gather indices
                pl.BlockSpec((P_ROWS, HID), lambda s: (0, 0)),           # packed params (shared)
            ],
            out_specs=pl.BlockSpec((None, 1, GE), lambda s: (s, 0, 0)),  # lane-dense row
        ),
        compiler_params=pltpu.CompilerParams(dimension_semantics=("parallel",)),
        cost_estimate=_cost_estimate(S),
    )(feat, adj, gidx, prm)

    return out.reshape(Bp, E)[:B]                                            # (B, E)


def gat_model_forward(edge_index, user_features, product_features, params):
    """Single-graph forward matching GAT_model.forward: returns (E,) predictions."""
    preds = gat_model_forward_batched(edge_index[None], user_features[None],
                                      product_features[None], params)
    return preds[0]


def ref_forward(edge_index, user_features, product_features, params):
    """Pure-JAX single-graph reference (dense math) for correctness check."""
    adj = _dense_adjacency(edge_index)
    user_x = user_features @ params["Wu"] + params["bu"]
    prod_x = product_features @ params["Wp"] + params["bp"]
    x = jnp.concatenate([user_x, prod_x], axis=0)

    h = x @ params["Wg"]
    a_dst = jnp.sum(h * params["att_dst"], axis=-1, keepdims=True)
    a_src = jnp.sum(h * params["att_src"], axis=-1, keepdims=True)
    scores = a_dst + a_src.T
    scores = jnp.where(scores > 0, scores, NEG_SLOPE * scores)
    masked = jnp.where(adj > 0, scores, -1e30)
    p = jnp.exp(masked - jnp.max(masked, axis=-1, keepdims=True)) * adj
    alpha = p / jnp.sum(p, axis=-1, keepdims=True)
    x = jnp.maximum(alpha @ h + params["bg"], 0.0)

    h2 = x @ params["Wc"]
    deg = jnp.sum(adj, axis=-1, keepdims=True)
    dis = jnp.where(deg > 0, 1.0 / jnp.sqrt(deg), 0.0)
    x = (dis * adj * dis.T) @ h2 + params["bc"]

    u = x[edge_index[0]]
    pr = x[edge_index[1]]
    u = u / jnp.maximum(jnp.linalg.norm(u, axis=-1, keepdims=True), L2_EPS)
    pr = pr / jnp.maximum(jnp.linalg.norm(pr, axis=-1, keepdims=True), L2_EPS)
    d = u * pr
    hdn = jnp.maximum(d @ params["W1"] + params["b1"], 0.0)
    return jnp.squeeze(hdn @ params["W2"] + params["b2"], axis=-1)


def init_params(key):
    ks = jax.random.split(key, 12)
    s = 0.1
    return {
        "Wu": s * jax.random.normal(ks[0], (FU, HID), jnp.float32),
        "bu": s * jax.random.normal(ks[1], (1, HID), jnp.float32),
        "Wp": s * jax.random.normal(ks[2], (FP, HID), jnp.float32),
        "bp": s * jax.random.normal(ks[3], (1, HID), jnp.float32),
        # GATConv (heads=1): lin has no bias, bias applied after aggregation
        "Wg": s * jax.random.normal(ks[4], (HID, HID), jnp.float32),
        "bg": s * jax.random.normal(ks[5], (1, HID), jnp.float32),
        "att_src": s * jax.random.normal(ks[6], (1, HID), jnp.float32),
        "att_dst": s * jax.random.normal(ks[7], (1, HID), jnp.float32),
        # GCNConv: lin has no bias, bias applied after aggregation
        "Wc": s * jax.random.normal(ks[8], (HID, HID), jnp.float32),
        "bc": s * jax.random.normal(ks[9], (1, HID), jnp.float32),
        # predictor MLP
        "W1": s * jax.random.normal(ks[10], (HID, HID), jnp.float32),
        "b1": jnp.zeros((1, HID), jnp.float32),
        "W2": s * jax.random.normal(ks[11], (HID, 1), jnp.float32),
        "b2": jnp.zeros((1, 1), jnp.float32),
    }


if __name__ == "__main__":
    key = jax.random.PRNGKey(0)
    k_uf, k_pf, k_par = jax.random.split(key, 3)

    B = 12   # not a multiple of G=8 -> exercises batch padding/masking; grid=(2,) when padded
    user_features_b = jax.random.normal(k_uf, (B, NU, FU), jnp.float32)
    product_features_b = jax.random.normal(k_pf, (B, NP, FP), jnp.float32)
    params = init_params(k_par)

    # deterministic, per-graph-unique bipartite edges (global node ids; no duplicate (u,v) pairs)
    u_idx = jnp.concatenate([jnp.arange(NU), jnp.arange(NU)]).astype(jnp.int32)
    eis = []
    for g in range(B):
        p_loc = jnp.concatenate([(3 * jnp.arange(NU) + g) % NP,
                                 (5 * jnp.arange(NU) + 1 + g) % NP]).astype(jnp.int32)
        eis.append(jnp.stack([u_idx, p_loc + NU], axis=0))                 # (2, E)
    edge_index_b = jnp.stack(eis, axis=0)                                  # (B, 2, E)

    # single-graph forward (matches the PyTorch module's forward signature/semantics)
    preds0 = gat_model_forward(edge_index_b[0], user_features_b[0], product_features_b[0], params)
    preds0 = jax.block_until_ready(preds0)
    ref0 = ref_forward(edge_index_b[0], user_features_b[0], product_features_b[0], params)
    assert preds0.shape == (E,)
    assert bool(jnp.all(jnp.isfinite(preds0)))
    assert bool(jnp.allclose(preds0, ref0, atol=1e-4, rtol=1e-3))

    # batched forward: one pallas_call, 8 graphs per grid step, padded tail masked off
    preds_b = gat_model_forward_batched(edge_index_b, user_features_b, product_features_b, params)
    preds_b = jax.block_until_ready(preds_b)
    assert preds_b.shape == (B, E)
    assert bool(jnp.all(jnp.isfinite(preds_b)))
    for g in range(B):
        ref_g = ref_forward(edge_index_b[g], user_features_b[g], product_features_b[g], params)
        assert bool(jnp.allclose(preds_b[g], ref_g, atol=1e-4, rtol=1e-3))

    print("KERNEL_OK")
</pallas_src>

<mosaic_0001>
module attributes {stable_mosaic.version = 11 : i64} {
  func.func @gat_model_kernel(%arg0: i32, %arg1: memref<1x128x26xf32, #tpu.memory_space<vmem>>, %arg2: memref<1x128x128xf32, #tpu.memory_space<vmem>>, %arg3: memref<1x256x1xi32, #tpu.memory_space<vmem>>, %arg4: memref<144x32xf32, #tpu.memory_space<vmem>>, %arg5: memref<1x1x128xf32, #tpu.memory_space<vmem>>) attributes {dimension_semantics = [#tpu.dimension_semantics<parallel>], iteration_bounds = array<i64: 1>, scalar_prefetch = 0 : i64, scratch_operands = 0 : i64, tpu.core_type = #tpu.core_type<tc>, window_params = [{transform_indices = @transform_0, window_bounds = array<i64: 1, 128, 26>}, {transform_indices = @transform_1, window_bounds = array<i64: 1, 128, 128>}, {transform_indices = @transform_2, window_bounds = array<i64: 1, 256, 1>}, {pipeline_mode = #tpu.pipeline_mode<synchronous>, transform_indices = @transform_3, window_bounds = array<i64: 144, 32>}, {transform_indices = @transform_4, window_bounds = array<i64: 1, 1, 128>}]} {
    %c0 = arith.constant 0 : index
    %c0_0 = arith.constant 0 : index
    %0 = vector.load %arg4[%c0, %c0_0] : memref<144x32xf32, #tpu.memory_space<vmem>>, vector<26x32xf32>
    %c32 = arith.constant 32 : index
    %c0_1 = arith.constant 0 : index
    %1 = vector.load %arg4[%c32, %c0_1] : memref<144x32xf32, #tpu.memory_space<vmem>>, vector<32x32xf32>
    %c64 = arith.constant 64 : index
    %c0_2 = arith.constant 0 : index
    %2 = vector.load %arg4[%c64, %c0_2] : memref<144x32xf32, #tpu.memory_space<vmem>>, vector<32x32xf32>
    %c96 = arith.constant 96 : index
    %c0_3 = arith.constant 0 : index
    %3 = vector.load %arg4[%c96, %c0_3] : memref<144x32xf32, #tpu.memory_space<vmem>>, vector<32x32xf32>
    %c128 = arith.constant 128 : index
    %c0_4 = arith.constant 0 : index
    %4 = vector.load %arg4[%c128, %c0_4] : memref<144x32xf32, #tpu.memory_space<vmem>>, vector<1x32xf32>
    %c129 = arith.constant 129 : index
    %c0_5 = arith.constant 0 : index
    %5 = vector.load %arg4[%c129, %c0_5] : memref<144x32xf32, #tpu.memory_space<vmem>>, vector<1x32xf32>
    %c130 = arith.constant 130 : index
    %c0_6 = arith.constant 0 : index
    %6 = vector.load %arg4[%c130, %c0_6] : memref<144x32xf32, #tpu.memory_space<vmem>>, vector<1x32xf32>
    %c131 = arith.constant 131 : index
    %c0_7 = arith.constant 0 : index
    %7 = vector.load %arg4[%c131, %c0_7] : memref<144x32xf32, #tpu.memory_space<vmem>>, vector<1x32xf32>
    %c132 = arith.constant 132 : index
    %c0_8 = arith.constant 0 : index
    %8 = vector.load %arg4[%c132, %c0_8] : memref<144x32xf32, #tpu.memory_space<vmem>>, vector<1x32xf32>
    %c133 = arith.constant 133 : index
    %c0_9 = arith.constant 0 : index
    %9 = vector.load %arg4[%c133, %c0_9] : memref<144x32xf32, #tpu.memory_space<vmem>>, vector<1x32xf32>
    %c134 = arith.constant 134 : index
    %c0_10 = arith.constant 0 : index
    %10 = vector.load %arg4[%c134, %c0_10] : memref<144x32xf32, #tpu.memory_space<vmem>>, vector<1x1xf32>
    %c0_11 = arith.constant 0 : index
    %c0_12 = arith.constant 0 : index
    %c0_13 = arith.constant 0 : index
    %11 = vector.load %arg2[%c0_11, %c0_12, %c0_13] : memref<1x128x128xf32, #tpu.memory_space<vmem>>, vector<1x128x128xf32>
    %12 = vector.shape_cast %11 : vector<1x128x128xf32> to vector<128x128xf32>
    %c0_14 = arith.constant 0 : index
    %c0_15 = arith.constant 0 : index
    %c0_16 = arith.constant 0 : index
    %13 = vector.load %arg1[%c0_14, %c0_15, %c0_16] : memref<1x128x26xf32, #tpu.memory_space<vmem>>, vector<1x128x26xf32>
    %14 = vector.shape_cast %13 : vector<1x128x26xf32> to vector<128x26xf32>
    %cst = arith.constant dense<0.000000e+00> : vector<128x32xf32>
    %15 = tpu.matmul %14, %0, %cst {dimension_numbers = #tpu.dot_dimension_numbers<[1], [0], [0], [1], [0, 0, 1, 1], [], []>} : vector<128x26xf32>, vector<26x32xf32>, vector<128x32xf32> -> vector<128x32xf32>
    %cst_17 = arith.constant dense<0.000000e+00> : vector<128x32xf32>
    %16 = tpu.matmul %15, %1, %cst_17 {dimension_numbers = #tpu.dot_dimension_numbers<[1], [0], [0], [1], [0, 0, 1, 1], [], []>} : vector<128x32xf32>, vector<32x32xf32>, vector<128x32xf32> -> vector<128x32xf32>
    %17 = vector.broadcast %6 : vector<1x32xf32> to vector<128x32xf32>
    %18 = arith.mulf %16, %17 : vector<128x32xf32>
    %cst_18 = arith.constant dense<0.000000e+00> : vector<128xf32>
    %19 = vector.multi_reduction <add>, %18, %cst_18 [1] : vector<128x32xf32> to vector<128xf32>
    %20 = vector.shape_cast %19 : vector<128xf32> to vector<128x1xf32>
    %cst_19 = arith.constant dense<0.000000e+00> : vector<1x128xf32>
    %21 = tpu.matmul %5, %16, %cst_19 {dimension_numbers = #tpu.dot_dimension_numbers<[1], [1], [0], [0], [0, 0, 1, 0], [], []>} : vector<1x32xf32>, vector<128x32xf32>, vector<1x128xf32> -> vector<1x128xf32>
    %22 = vector.broadcast %20 : vector<128x1xf32> to vector<128x128xf32>
    %23 = vector.broadcast %21 : vector<1x128xf32> to vector<128x128xf32>
    %24 = arith.addf %22, %23 : vector<128x128xf32>
    %cst_20 = arith.constant 0.000000e+00 : f32
    %25 = vector.broadcast %cst_20 : f32 to vector<128x128xf32>
    %26 = arith.cmpf ogt, %24, %25 : vector<128x128xf32>
    %cst_21 = arith.constant 2.000000e-01 : f32
    %27 = vector.broadcast %cst_21 : f32 to vector<128x128xf32>
    %28 = arith.mulf %27, %24 : vector<128x128xf32>
    %29 = arith.select %26, %24, %28 : vector<128x128xi1>, vector<128x128xf32>
    %cst_22 = arith.constant 0.000000e+00 : f32
    %30 = vector.broadcast %cst_22 : f32 to vector<128x128xf32>
    %31 = arith.cmpf ogt, %12, %30 : vector<128x128xf32>
    %cst_23 = arith.constant -1.000000e+30 : f32
    %32 = vector.broadcast %cst_23 : f32 to vector<128x128xf32>
    %33 = arith.select %31, %29, %32 : vector<128x128xi1>, vector<128x128xf32>
    %cst_24 = arith.constant dense<0xFF800000> : vector<128xf32>
    %34 = vector.multi_reduction <maximumf>, %33, %cst_24 [1] : vector<128x128xf32> to vector<128xf32>
    %35 = vector.shape_cast %34 : vector<128xf32> to vector<128x1xf32>
    %36 = vector.broadcast %35 : vector<128x1xf32> to vector<128x128xf32>
    %37 = arith.subf %33, %36 : vector<128x128xf32>
    %38 = math.exp %37 : vector<128x128xf32>
    %39 = arith.mulf %38, %12 : vector<128x128xf32>
    %cst_25 = arith.constant dense<0.000000e+00> : vector<128xf32>
    %40 = vector.multi_reduction <add>, %39, %cst_25 [1] : vector<128x128xf32> to vector<128xf32>
    %41 = vector.shape_cast %40 : vector<128xf32> to vector<128x1xf32>
    %42 = vector.broadcast %41 : vector<128x1xf32> to vector<128x128xf32>
    %43 = arith.divf %39, %42 : vector<128x128xf32>
    %cst_26 = arith.constant dense<0.000000e+00> : vector<128x32xf32>
    %44 = tpu.matmul %43, %16, %cst_26 {dimension_numbers = #tpu.dot_dimension_numbers<[1], [0], [0], [1], [0, 0, 1, 1], [], []>} : vector<128x128xf32>, vector<128x32xf32>, vector<128x32xf32> -> vector<128x32xf32>
    %45 = vector.broadcast %4 : vector<1x32xf32> to vector<128x32xf32>
    %46 = arith.addf %44, %45 : vector<128x32xf32>
    %cst_27 = arith.constant 0.000000e+00 : f32
    %47 = vector.broadcast %cst_27 : f32 to vector<128x32xf32>
    %48 = arith.maximumf %46, %47 : vector<128x32xf32>
    %cst_28 = arith.constant dense<0.000000e+00> : vector<128x32xf32>
    %49 = tpu.matmul %48, %2, %cst_28 {dimension_numbers = #tpu.dot_dimension_numbers<[1], [0], [0], [1], [0, 0, 1, 1], [], []>} : vector<128x32xf32>, vector<32x32xf32>, vector<128x32xf32> -> vector<128x32xf32>
    %cst_29 = arith.constant dense<0.000000e+00> : vector<128xf32>
    %50 = vector.multi_reduction <add>, %12, %cst_29 [1] : vector<128x128xf32> to vector<128xf32>
    %51 = vector.shape_cast %50 : vector<128xf32> to vector<128x1xf32>
    %52 = math.rsqrt %51 : vector<128x1xf32>
    %53 = vector.broadcast %52 : vector<128x1xf32> to vector<128x32xf32>
    %54 = arith.mulf %53, %49 : vector<128x32xf32>
    %cst_30 = arith.constant dense<0.000000e+00> : vector<128x32xf32>
    %55 = tpu.matmul %12, %54, %cst_30 {dimension_numbers = #tpu.dot_dimension_numbers<[1], [0], [0], [1], [0, 0, 1, 1], [], []>} : vector<128x128xf32>, vector<128x32xf32>, vector<128x32xf32> -> vector<128x32xf32>
    %56 = vector.broadcast %52 : vector<128x1xf32> to vector<128x32xf32>
    %57 = arith.mulf %56, %55 : vector<128x32xf32>
    %58 = vector.broadcast %7 : vector<1x32xf32> to vector<128x32xf32>
    %59 = arith.addf %57, %58 : vector<128x32xf32>
    %c0_31 = arith.constant 0 : index
    %c0_32 = arith.constant 0 : index
    %c0_33 = arith.constant 0 : index
    %60 = vector.load %arg3[%c0_31, %c0_32, %c0_33] : memref<1x256x1xi32, #tpu.memory_space<vmem>>, vector<1x256x1xi32>
    %61 = vector.shape_cast %60 : vector<1x256x1xi32> to vector<256x1xi32>
    %62 = tpu.iota {dimensions = array<i32: 1>} : vector<256x128xi32>
    %63 = vector.broadcast %61 : vector<256x1xi32> to vector<256x128xi32>
    %64 = arith.cmpi eq, %62, %63 : vector<256x128xi32>
    %65 = arith.extui %64 : vector<256x128xi1> to vector<256x128xi32>
    %66 = arith.sitofp %65 : vector<256x128xi32> to vector<256x128xf32>
    %cst_34 = arith.constant dense<0.000000e+00> : vector<256x32xf32>
    %67 = tpu.matmul %66, %59, %cst_34 {dimension_numbers = #tpu.dot_dimension_numbers<[1], [0], [0], [1], [0, 0, 1, 1], [], []>} : vector<256x128xf32>, vector<128x32xf32>, vector<256x32xf32> -> vector<256x32xf32>
    %68 = vector.extract_strided_slice %67 {offsets = [0, 0], sizes = [128, 32], strides = [1, 1]} : vector<256x32xf32> to vector<128x32xf32>
    %69 = vector.extract_strided_slice %67 {offsets = [128, 0], sizes = [128, 32], strides = [1, 1]} : vector<256x32xf32> to vector<128x32xf32>
    %70 = arith.mulf %68, %68 : vector<128x32xf32>
    %cst_35 = arith.constant dense<0.000000e+00> : vector<128xf32>
    %71 = vector.multi_reduction <add>, %70, %cst_35 [1] : vector<128x32xf32> to vector<128xf32>
    %72 = vector.shape_cast %71 : vector<128xf32> to vector<128x1xf32>
    %73 = math.sqrt %72 : vector<128x1xf32>
    %cst_36 = arith.constant 9.99999996E-13 : f32
    %74 = vector.broadcast %cst_36 : f32 to vector<128x1xf32>
    %75 = arith.maximumf %73, %74 : vector<128x1xf32>
    %76 = vector.broadcast %75 : vector<128x1xf32> to vector<128x32xf32>
    %77 = arith.divf %68, %76 : vector<128x32xf32>
    %78 = arith.mulf %69, %69 : vector<128x32xf32>
    %cst_37 = arith.constant dense<0.000000e+00> : vector<128xf32>
    %79 = vector.multi_reduction <add>, %78, %cst_37 [1] : vector<128x32xf32> to vector<128xf32>
    %80 = vector.shape_cast %79 : vector<128xf32> to vector<128x1xf32>
    %81 = math.sqrt %80 : vector<128x1xf32>
    %cst_38 = arith.constant 9.99999996E-13 : f32
    %82 = vector.broadcast %cst_38 : f32 to vector<128x1xf32>
    %83 = arith.maximumf %81, %82 : vector<128x1xf32>
    %84 = vector.broadcast %83 : vector<128x1xf32> to vector<128x32xf32>
    %85 = arith.divf %69, %84 : vector<128x32xf32>
    %86 = arith.mulf %77, %85 : vector<128x32xf32>
    %cst_39 = arith.constant dense<0.000000e+00> : vector<128x32xf32>
    %87 = tpu.matmul %86, %3, %cst_39 {dimension_numbers = #tpu.dot_dimension_numbers<[1], [0], [0], [1], [0, 0, 1, 1], [], []>} : vector<128x32xf32>, vector<32x32xf32>, vector<128x32xf32> -> vector<128x32xf32>
    %88 = vector.broadcast %8 : vector<1x32xf32> to vector<128x32xf32>
    %89 = arith.addf %87, %88 : vector<128x32xf32>
    %cst_40 = arith.constant 0.000000e+00 : f32
    %90 = vector.broadcast %cst_40 : f32 to vector<128x32xf32>
    %91 = arith.maximumf %89, %90 : vector<128x32xf32>
    %cst_41 = arith.constant dense<0.000000e+00> : vector<1x128xf32>
    %92 = tpu.matmul %9, %91, %cst_41 {dimension_numbers = #tpu.dot_dimension_numbers<[1], [1], [0], [0], [0, 0, 1, 0], [], []>} : vector<1x32xf32>, vector<128x32xf32>, vector<1x128xf32> -> vector<1x128xf32>
    %93 = vector.broadcast %10 : vector<1x1xf32> to vector<1x128xf32>
    %94 = arith.addf %92, %93 : vector<1x128xf32>
    %c0_42 = arith.constant 0 : index
    %c0_43 = arith.constant 0 : index
    %c0_44 = arith.constant 0 : index
    %95 = vector.load %arg5[%c0_42, %c0_43, %c0_44] : memref<1x1x128xf32, #tpu.memory_space<vmem>>, vector<1x1x128xf32>
    %96 = vector.shape_cast %95 : vector<1x1x128xf32> to vector<1x128xf32>
    %97 = vector.shape_cast %94 : vector<1x128xf32> to vector<1x1x128xf32>
    tpu.vector_store %arg5[%c0_42, %c0_43, %c0_44], %97 {strides = array<i32>} : memref<1x1x128xf32, #tpu.memory_space<vmem>>, vector<1x1x128xf32>,
    return
  }
  func.func @transform_0(%arg0: i32) -> (i32, i32, i32) {
    %c0_i32 = arith.constant 0 : i32
    %c0_i32_0 = arith.constant 0 : i32
    %c0_i32_1 = arith.constant 0 : i32
    return %arg0, %c0_i32, %c0_i32_0 : i32, i32, i32
  }
  func.func @transform_1(%arg0: i32) -> (i32, i32, i32) {
    %c0_i32 = arith.constant 0 : i32
    %c0_i32_0 = arith.constant 0 : i32
    %c0_i32_1 = arith.constant 0 : i32
    return %arg0, %c0_i32, %c0_i32_0 : i32, i32, i32
  }
  func.func @transform_2(%arg0: i32) -> (i32, i32, i32) {
    %c0_i32 = arith.constant 0 : i32
    %c0_i32_0 = arith.constant 0 : i32
    %c0_i32_1 = arith.constant 0 : i32
    return %arg0, %c0_i32, %c0_i32_0 : i32, i32, i32
  }
  func.func @transform_3(%arg0: i32) -> (i32, i32) {
    %c0_i32 = arith.constant 0 : i32
    %c0_i32_0 = arith.constant 0 : i32
    %c0_i32_1 = arith.constant 0 : i32
    return %c0_i32, %c0_i32_0 : i32, i32
  }
  func.func @transform_4(%arg0: i32) -> (i32, i32, i32) {
    %c0_i32 = arith.constant 0 : i32
    %c0_i32_0 = arith.constant 0 : i32
    %c0_i32_1 = arith.constant 0 : i32
    return %arg0, %c0_i32, %c0_i32_0 : i32, i32, i32
  }
}

</mosaic_0001>

<bundles_post_ra>
// kernel: gat_model_forward_batched.1
= control target key start
LH: loop header
LB: loop body
LE: loop exit
PB: predicated region body
PF: predicated region fallthrough
CT: control target
= control target key end

     0   :  { %vm121_vm0 = vcmask 1041408   ;;  %vm72_vm1 = vcmask 211968   ;;  %vm3995_vm2 = vmmov 1   ;;  %vm270_vm4 = vcmask 261120   ;;  %s5479_s3 = inlined_call_operand.vmem [shape: f32[144,32], index: 3, kind: input, shape index: {}]   ;;  %s5480_s0 = inlined_call_operand.vmem [shape: f32[1,128,26], index: 0, kind: input, shape index: {}]   ;;  %s5481_s1 = inlined_call_operand.vmem [shape: f32[1,128,128], index: 1, kind: input, shape index: {}]   ;;  %s5482_s2 = inlined_call_operand.vmem [shape: s32[1,256,1], index: 2, kind: input, shape index: {}]   ;;  %s5483_s4 = inlined_call_operand.vmem [shape: f32[1,1,128], index: 4, kind: output, shape index: {}]  }
   0x1   :  { %v17_v0 = vld [vmem:[%s5479_s3] sm:$0xff]  ;;  %v18_v1 = vld [vmem:[%s5479_s3 + $0x8] sm:$0xff]  ;;  %v19_v2 = vld [vmem:[%s5479_s3 + $0x10] sm:$0xff]  ;;  %v5484_v44 = vmov 0.0|0.0   ;;  %vm3997_vm5 = vmmov 0   ;;  %v3998_v45 = vmov 0.0  }
   0x2   :  { %v3558_v3 = vpack.c.bf16 %v18_v1, %v17_v0  ;;  %v20_v4 = vld [vmem:[%s5479_s3 + $0x18] sm:$0x3]  ;;  %v56_v5 = vld [vmem:[%s5480_s0] sm:$0xff]  ;;  %vm3563_vm3 = vmpackc.low %vm121_vm0, %vm3995_vm2  ;;  %v5488_v49 = vmov 0 }
   0x3   :  { %v3562_v6 = vpack.c.bf16 %v20_v4, %v19_v2  ;;  %3176 = vmatprep.mubr.msk.f32.mxu0 %vm72_vm1, %v56_v5  ;;  %v21_v7 = vld [vmem:[%s5479_s3 + $0x20] sm:$0xff]  ;;  %v22_v8 = vld [vmem:[%s5479_s3 + $0x28] sm:$0xff]  ;;  %v23_v9 = vld [vmem:[%s5479_s3 + $0x30] sm:$0xff] }
   0x4   :  { %3559 = vmatprep.subr.bf16.mxu0 %v3558_v3  ;;  %v57_v10 = vld [vmem:[%s5480_s0 + $0x8] sm:$0xff]  ;;  %v3568_v11 = vpack.c.bf16 %v22_v8, %v21_v7  ;;  %v24_v12 = vld [vmem:[%s5479_s3 + $0x38] sm:$0xff]  ;;  %v58_v13 = vld [vmem:[%s5480_s0 + $0x10] sm:$0xff] }
   0x5   :  { %3561 = vmatpush3.bf16.msra.mxu0 %v3558_v3  ;;  %v3572_v14 = vpack.c.bf16 %v24_v12, %v23_v9  ;;  %v59_v15 = vld [vmem:[%s5480_s0 + $0x18] sm:$0xff]  ;;  %v60_v16 = vld [vmem:[%s5480_s0 + $0x20] sm:$0xff]  ;;  %v61_v17 = vld [vmem:[%s5480_s0 + $0x28] sm:$0xff] }
   0x6   :  { %3564 = vmatprep.subr.msk.bf16.mxu0 %vm3563_vm3, %v3562_v6  ;;  %3569 = vmatprep.subr.bf16.mxu1 %v3568_v11  ;;  %v62_v18 = vld [vmem:[%s5480_s0 + $0x30] sm:$0xff]  ;;  %v63_v19 = vld [vmem:[%s5480_s0 + $0x38] sm:$0xff]  ;;  %v64_v20 = vld [vmem:[%s5480_s0 + $0x40] sm:$0xff] }
   0x7   :  { %3571 = vmatpush3.bf16.msra.mxu1 %v3568_v11  ;;  %v65_v21 = vld [vmem:[%s5480_s0 + $0x48] sm:$0xff]  ;;  %v66_v22 = vld [vmem:[%s5480_s0 + $0x50] sm:$0xff]  ;;  %v67_v23 = vld [vmem:[%s5480_s0 + $0x58] sm:$0xff] }
   0x8   :  { %3573 = vmatprep.subr.bf16.mxu1 %v3572_v14  ;;  %v68_v24 = vld [vmem:[%s5480_s0 + $0x60] sm:$0xff]  ;;  %v69_v25 = vld [vmem:[%s5480_s0 + $0x68] sm:$0xff]  ;;  %v70_v26 = vld [vmem:[%s5480_s0 + $0x70] sm:$0xff] }
   0x9   :  { %3567 = vmatpush3.bf16.msk.msra.mxu0 %vm3563_vm3, %v3562_v6  ;;  %v71_v27 = vld [vmem:[%s5480_s0 + $0x78] sm:$0xff]  ;;  %v4136_v46 = vld [vmem:[%s5479_s3 + $0x82] ss:$0 sm:$0xff]  ;;  %vm4140_vm6 = vmpackc.low %vm270_vm4, %vm270_vm4 }
   0xa   :  { %3576 = vmatprep.subr.bf16.mxu0 %v5484_v44  ;;  %v5489_v49 = vsel %vm4140_vm6, 4294967295, %v5488_v49 }
   0xb   :  { %3575 = vmatpush3.bf16.msra.mxu1 %v3572_v14  ;;  %5490 = vst [vmem:[#allocation2_spill] sm:$0xff] %v5489_v49 }
   0xc   :  { %3177 = vmatmul.mubr.msk.f32.vlgmr.msra.gmra.mrb[0].mxu0 %vm72_vm1, %v57_v10 }
   0xd   :  { %3179 = vmatprep.mubr.msk.f32.mxu0 %vm72_vm1, %v58_v13 }
  0x10   :  { %3180 = vmatmul.mubr.msk.f32.gmra.mrb[2].mxu0 %vm72_vm1, %v59_v15 }
  0x11   :  { %3182 = vmatprep.mubr.msk.f32.mxu0 %vm72_vm1, %v60_v16 }
  0x14   :  { %3183 = vmatmul.mubr.msk.f32.gmra.mrb[4].mxu0 %vm72_vm1, %v61_v17 }
  0x15   :  { %3185 = vmatprep.mubr.msk.f32.mxu0 %vm72_vm1, %v62_v18 }
  0x18   :  { %3186 = vmatmul.mubr.msk.f32.gmra.mrb[6].mxu0 %vm72_vm1, %v63_v19 }
  0x19   :  { %3188 = vmatprep.mubr.msk.f32.mxu0 %vm72_vm1, %v64_v20 }
  0x1c   :  { %3189 = vmatmul.mubr.msk.f32.gmra.mrb[8].mxu0 %vm72_vm1, %v65_v21 }
  0x1d   :  { %3191 = vmatprep.mubr.msk.f32.mxu0 %vm72_vm1, %v66_v22 }
  0x20   :  { %3192 = vmatmul.mubr.msk.f32.gmra.mrb[10].mxu0 %vm72_vm1, %v67_v23 }
  0x21   :  { %3194 = vmatprep.mubr.msk.f32.mxu0 %vm72_vm1, %v68_v24 }
  0x24   :  { %3195 = vmatmul.mubr.msk.f32.gmra.mrb[12].mxu0 %vm72_vm1, %v69_v25 }
  0x25   :  { %3197 = vmatprep.mubr.msk.f32.mxu0 %vm72_vm1, %v70_v26 }
  0x28   :  { %3198 = vmatmul.mubr.msk.f32.gmra.mrb[14].mxu0 %vm72_vm1, %v71_v27 }
  0x29   :  { %3264 = vmatprep.mubr.msk.f32.mxu0 %vm3997_vm5, %v3998_v45 }
  0xdf   :  { %v3178_v28 = vpop.f32.mrb[0].mxu0 }
  0xe0   :  { %v191_v29 = vpop.f32.mrb[1].mxu0 }
  0xe1   :  { %3208 = vmatprep.mubr.msk.f32.mxu1 %vm270_vm4, %v191_v29 }
  0xe2   :  { %3209 = vmatmul.mubr.msk.f32.vlgmr.msra.gmra.mrb[0].mxu1 %vm270_vm4, %v3178_v28 }
  0xe3   :  { %v3181_v30 = vpop.f32.mrb[2].mxu0 }
  0xe4   :  { %v201_v31 = vpop.f32.mrb[3].mxu0 }
  0xe5   :  { %3211 = vmatprep.mubr.msk.f32.mxu1 %vm270_vm4, %v201_v31 }
  0xe6   :  { %3212 = vmatmul.mubr.msk.f32.gmra.mrb[2].mxu1 %vm270_vm4, %v3181_v30 }
  0xe7   :  { %v3184_v32 = vpop.f32.mrb[4].mxu0 }
  0xe8   :  { %v211_v33 = vpop.f32.mrb[5].mxu0 }
  0xe9   :  { %3214 = vmatprep.mubr.msk.f32.mxu1 %vm270_vm4, %v211_v33 }
  0xea   :  { %3215 = vmatmul.mubr.msk.f32.gmra.mrb[4].mxu1 %vm270_vm4, %v3184_v32 }
  0xeb   :  { %v3187_v34 = vpop.f32.mrb[6].mxu0 }
  0xec   :  { %v221_v35 = vpop.f32.mrb[7].mxu0 }
  0xed   :  { %3217 = vmatprep.mubr.msk.f32.mxu1 %vm270_vm4, %v221_v35 }
  0xee   :  { %3218 = vmatmul.mubr.msk.f32.gmra.mrb[6].mxu1 %vm270_vm4, %v3187_v34 }
  0xef   :  { %v3190_v36 = vpop.f32.mrb[8].mxu0 }
  0xf0   :  { %v231_v37 = vpop.f32.mrb[9].mxu0 }
  0xf1   :  { %3220 = vmatprep.mubr.msk.f32.mxu1 %vm270_vm4, %v231_v37 }
  0xf2   :  { %3221 = vmatmul.mubr.msk.f32.gmra.mrb[8].mxu1 %vm270_vm4, %v3190_v36 }
  0xf3   :  { %v3193_v38 = vpop.f32.mrb[10].mxu0 }
  0xf4   :  { %v241_v39 = vpop.f32.mrb[11].mxu0 }
  0xf5   :  { %3223 = vmatprep.mubr.msk.f32.mxu1 %vm270_vm4, %v241_v39 }
  0xf6   :  { %3224 = vmatmul.mubr.msk.f32.gmra.mrb[10].mxu1 %vm270_vm4, %v3193_v38 }
  0xf7   :  { %v3196_v40 = vpop.f32.mrb[12].mxu0 }
  0xf8   :  { %v251_v41 = vpop.f32.mrb[13].mxu0 }
  0xf9   :  { %3226 = vmatprep.mubr.msk.f32.mxu1 %vm270_vm4, %v251_v41  ;;  %v4206_v41 = vld [vmem:[%s5481_s1] sm:$0xff] }
  0xfa   :  { %3227 = vmatmul.mubr.msk.f32.gmra.mrb[12].mxu1 %vm270_vm4, %v3196_v40  ;;  %v34_v40 = vld [vmem:[%s5479_s3 + $0x81] sm:$0x1]  ;;  %vm721_vm8 = vcmp.gt.f32.partialorder %v4206_v41, 0.0 }
  0xfb   :  { %v3199_v42 = vpop.f32.mrb[14].mxu0 }
  0xfc   :  { %v261_v43 = vpop.f32.mrb[15].mxu0 }
  0xfd   :  { %3229 = vmatprep.mubr.msk.f32.mxu1 %vm270_vm4, %v261_v43 }
  0xfe   :  { %3230 = vmatmul.mubr.msk.f32.gmra.mrb[14].mxu1 %vm270_vm4, %v3199_v42  ;;  %v653_v42 = vlaneseq }
 0x1b5   :  { %v3210_v47 = vpop.f32.mrb[0].mxu1 }
 0x1b6   :  { %v385_v48 = vpop.f32.mrb[1].mxu1  ;;  %v469_v52 = vmul.f32 %v3210_v47, %v4136_v46 }
 0x1b7   :  { %v3577_v50 = vpack.c.bf16 %v3210_v47, %v385_v48  ;;  %v468_v51 = vmul.f32 %v4136_v46, %v385_v48  ;;  %v654_v47 = vshrl.u32 %v653_v42, 7 }
 0x1b8   :  { %v487_v58 = vsel %vm270_vm4, %v469_v52, 0.0 }
 0x1b9   :  { %v3213_v53 = vpop.f32.mrb[2].mxu1  ;;  %3579 = vmatpush3.bf16.xpose.msk.msra.mxu0 %vm4140_vm6, %v3577_v50  ;;  %3609 = vmatprep.subr.bf16.mxu1 %v3577_v50  ;;  %v484_v54 = vsel %vm270_vm4, %v468_v51, 0.0 }
 0x1ba   :  { %3611 = vmatpush3.bf16.msra.mxu1 %v3577_v50  ;;  %485 = vadd.xlane.f32.xlu0 %v484_v54  ;;  %v395_v55 = vpop.f32.mrb[3].mxu1  ;;  %v471_v61 = vmul.f32 %v3213_v53, %v4136_v46  ;;  %v655_v50 = vsub.s32 0, %v654_v47 }
 0x1bb   :  { %v3581_v56 = vpack.c.bf16 %v3213_v53, %v395_v55  ;;  %v470_v57 = vmul.f32 %v4136_v46, %v395_v55  ;;  %3580 = vmatprep.subr.bf16.mxu0 %v5484_v44  ;;  %v4215_v55 = vld [vmem:[%s5481_s1 + $0x8] sm:$0xff] }
 0x1bc   :  { %v493_v4 = vsel %vm270_vm4, %v471_v61, 0.0  ;;  %vm722_vm7 = vcmp.gt.f32.partialorder %v4215_v55, 0.0 }
 0x1bd   :  { %3613 = vmatprep.subr.bf16.mxu1 %v3581_v56  ;;  %v490_v59 = vsel %vm270_vm4, %v470_v57, 0.0  ;;  %v3216_v60 = vpop.f32.mrb[4].mxu1 }
 0x1be   :  { %488 = vadd.xlane.f32.xlu0 %v487_v58  ;;  %3615 = vmatpush3.bf16.msra.mxu1 %v3581_v56  ;;  %v405_v62 = vpop.f32.mrb[5].mxu1  ;;  %v473_v1 = vmul.f32 %v3216_v60, %v4136_v46 }
 0x1bf   :  { %491 = vadd.xlane.f32.xlu1 %v490_v59  ;;  %v472_v63 = vmul.f32 %v4136_v46, %v405_v62  ;;  %v3585_v0 = vpack.c.bf16 %v3216_v60, %v405_v62  ;;  %v4226_v62 = vld [vmem:[%s5481_s1 + $0x18] sm:$0xff] }
 0x1c0   :  { %v499_v8 = vsel %vm270_vm4, %v473_v1, 0.0  ;;  %vm724_vm13 = vcmp.gt.f32.partialorder %v4226_v62, 0.0 }
 0x1c1   :  { %3583 = vmatpush3.bf16.xpose.msk.msra.mxu0 %vm4140_vm6, %v3581_v56  ;;  %3617 = vmatprep.subr.bf16.mxu1 %v3585_v0  ;;  %v496_v2 = vsel %vm270_vm4, %v472_v63, 0.0  ;;  %v3219_v3 = vpop.f32.mrb[6].mxu1  ;;  %v4231_v63 = vld [vmem:[%s5481_s1 + $0x10] sm:$0xff] }
 0x1c2   :  { %3619 = vmatpush3.bf16.msra.mxu1 %v3585_v0  ;;  %497 = vadd.xlane.f32.xlu0 %v496_v2  ;;  %v415_v5 = vpop.f32.mrb[7].mxu1  ;;  %v475_v9 = vmul.f32 %v3219_v3, %v4136_v46  ;;  %vm723_vm14 = vcmp.gt.f32.partialorder %v4231_v63, 0.0 }
 0x1c3   :  { %494 = vadd.xlane.f32.xlu1 %v493_v4  ;;  %3584 = vmatprep.subr.bf16.mxu0 %v5484_v44  ;;  %v474_v6 = vmul.f32 %v4136_v46, %v415_v5  ;;  %v3589_v7 = vpack.c.bf16 %v3219_v3, %v415_v5 }
 0x1c4   :  { %v505_v15 = vsel %vm270_vm4, %v475_v9, 0.0 }
 0x1c5   :  { %3621 = vmatprep.subr.bf16.mxu1 %v3589_v7  ;;  %v502_v10 = vsel %vm270_vm4, %v474_v6, 0.0  ;;  %v3222_v11 = vpop.f32.mrb[8].mxu1 }
 0x1c6   :  { %3623 = vmatpush3.bf16.msra.mxu1 %v3589_v7  ;;  %503 = vadd.xlane.f32.xlu0 %v502_v10  ;;  %v425_v12 = vpop.f32.mrb[9].mxu1  ;;  %v477_v16 = vmul.f32 %v3222_v11, %v4136_v46  ;;  %v4240_v10 = vld [vmem:[%s5481_s1 + $0x28] sm:$0xff] }
 0x1c7   :  { %500 = vadd.xlane.f32.xlu1 %v499_v8  ;;  %v476_v13 = vmul.f32 %v4136_v46, %v425_v12  ;;  %v3593_v14 = vpack.c.bf16 %v3222_v11, %v425_v12  ;;  %v4245_v11 = vld [vmem:[%s5481_s1 + $0x20] sm:$0xff]  ;;  %vm726_vm1 = vcmp.gt.f32.partialorder %v4240_v10, 0.0 }
 0x1c8   :  { %v511_v22 = vsel %vm270_vm4, %v477_v16, 0.0  ;;  %vm725_vm2 = vcmp.gt.f32.partialorder %v4245_v11, 0.0 }
 0x1c9   :  { %3587 = vmatpush3.bf16.xpose.msk.msra.mxu0 %vm4140_vm6, %v3585_v0  ;;  %3625 = vmatprep.subr.bf16.mxu1 %v3593_v14  ;;  %v508_v17 = vsel %vm270_vm4, %v476_v13, 0.0  ;;  %v3225_v18 = vpop.f32.mrb[10].mxu1 }
 0x1ca   :  { %3588 = vmatprep.subr.bf16.mxu0 %v5484_v44  ;;  %3627 = vmatpush3.bf16.msra.mxu1 %v3593_v14  ;;  %v435_v19 = vpop.f32.mrb[11].mxu1  ;;  %v479_v23 = vmul.f32 %v3225_v18, %v4136_v46 }
 0x1cb   :  { %506 = vadd.xlane.f32.xlu1 %v505_v15  ;;  %509 = vadd.xlane.f32.xlu0 %v508_v17  ;;  %v478_v20 = vmul.f32 %v4136_v46, %v435_v19  ;;  %v3597_v21 = vpack.c.bf16 %v3225_v18, %v435_v19 }
 0x1cc   :  { %v517_v29 = vsel %vm270_vm4, %v479_v23, 0.0  ;;  %v4271_v23 = vld [vmem:[%s5481_s1 + $0x30] sm:$0xff] }
 0x1cd   :  { %3629 = vmatprep.subr.bf16.mxu1 %v3597_v21  ;;  %v514_v24 = vsel %vm270_vm4, %v478_v20, 0.0  ;;  %v3228_v25 = vpop.f32.mrb[12].mxu1 }
 0x1ce   :  { %3631 = vmatpush3.bf16.msra.mxu1 %v3597_v21  ;;  %v445_v26 = vpop.f32.mrb[13].mxu1  ;;  %v481_v30 = vmul.f32 %v3228_v25, %v4136_v46 }
 0x1cf   :  { %512 = vadd.xlane.f32.xlu1 %v511_v22  ;;  %515 = vadd.xlane.f32.xlu0 %v514_v24  ;;  %v480_v27 = vmul.f32 %v4136_v46, %v445_v26  ;;  %v3601_v28 = vpack.c.bf16 %v3228_v25, %v445_v26  ;;  %v4266_v22 = vld [vmem:[%s5481_s1 + $0x38] sm:$0xff] }
 0x1d0   :  { %v523_v36 = vsel %vm270_vm4, %v481_v30, 0.0 }
 0x1d1   :  { %3591 = vmatpush3.bf16.xpose.msk.msra.mxu0 %vm4140_vm6, %v3589_v7  ;;  %3633 = vmatprep.subr.bf16.mxu1 %v3601_v28  ;;  %v520_v31 = vsel %vm270_vm4, %v480_v27, 0.0  ;;  %v3231_v32 = vpop.f32.mrb[14].mxu1 }
 0x1d2   :  { %3592 = vmatprep.subr.bf16.mxu0 %v5484_v44  ;;  %3635 = vmatpush3.bf16.msra.mxu1 %v3601_v28  ;;  %v455_v33 = vpop.f32.mrb[15].mxu1  ;;  %v483_v37 = vmul.f32 %v3231_v32, %v4136_v46 }
 0x1d3   :  { %518 = vadd.xlane.f32.xlu1 %v517_v29  ;;  %521 = vadd.xlane.f32.xlu0 %v520_v31  ;;  %v482_v34 = vmul.f32 %v4136_v46, %v455_v33  ;;  %v3605_v35 = vpack.c.bf16 %v3231_v32, %v455_v33 }
 0x1d4   :  { %v529_v39 = vsel %vm270_vm4, %v483_v37, 0.0  ;;  %v4303_v37 = vld [vmem:[%s5481_s1 + $0x40] sm:$0xff] }
 0x1d5   :  { %3637 = vmatprep.subr.bf16.mxu1 %v3605_v35  ;;  %v526_v38 = vsel %vm270_vm4, %v482_v34, 0.0 }
 0x1d6   :  { %3639 = vmatpush3.bf16.msra.mxu1 %v3605_v35 }
 0x1d7   :  { %524 = vadd.xlane.f32.xlu1 %v523_v36  ;;  %527 = vadd.xlane.f32.xlu0 %v526_v38  ;;  %v4298_v36 = vld [vmem:[%s5481_s1 + $0x48] sm:$0xff] }
 0x1d9   :  { %3595 = vmatpush3.bf16.xpose.msk.msra.mxu0 %vm4140_vm6, %v3593_v14 }
 0x1da   :  { %3596 = vmatprep.subr.bf16.mxu0 %v5484_v44 }
 0x1db   :  { %530 = vadd.xlane.f32.xlu1 %v529_v39 }
 0x1e1   :  { %3599 = vmatpush3.bf16.xpose.msk.msra.mxu0 %vm4140_vm6, %v3597_v21 }
 0x1e2   :  { %3600 = vmatprep.subr.bf16.mxu0 %v5484_v44 }
 0x1e9   :  { %3603 = vmatpush3.bf16.xpose.msk.msra.mxu0 %vm4140_vm6, %v3601_v28 }
 0x1ea   :  { %3604 = vmatprep.subr.bf16.mxu0 %v5484_v44 }
 0x1f1   :  { %3607 = vmatpush3.bf16.xpose.msk.msra.mxu0 %vm4140_vm6, %v3605_v35 }
 0x1f8   :  { %3265 = vmatmul.mubr.msk.f32.vlgmr.msra.gmra.mrb[16].mxu0 %vm270_vm4, %v34_v40 }
 0x1f9   :  { %3387 = vmatprep.mubr.f32.mxu0 %v4206_v41 }
 0x247   :  { %v486_v46 = vpop.xlane.xlu0 %485 }
 0x24b   :  { %v489_v51 = vpop.xlane.xlu0 %488 }
 0x24c   :  { %v492_v43 = vpop.xlane.xlu1 %491 }
 0x24f   :  { %v498_v57 = vpop.xlane.xlu0 %497 }
 0x250   :  { %v495_v48 = vpop.xlane.xlu1 %494 }
 0x253   :  { %v504_v7 = vpop.xlane.xlu0 %503 }
 0x254   :  { %v501_v56 = vpop.xlane.xlu1 %500 }
 0x258   :  { %v507_v4 = vpop.xlane.xlu1 %506  ;;  %v510_v21 = vpop.xlane.xlu0 %509 }
 0x25c   :  { %v513_v19 = vpop.xlane.xlu1 %512  ;;  %v516_v33 = vpop.xlane.xlu0 %515 }
 0x260   :  { %v519_v32 = vpop.xlane.xlu1 %518 }
 0x2cb   :  { %v649_v52 = vpop.f32.mrb[16].mxu0 }
 0x2cc   :  { %v4210_v53 = vrot.slane %v649_v52, %v655_v50  ;;  %v3266_v54 = vpop.f32.mrb[17].mxu0  ;;  %v522_v50 = vpop.xlane.xlu0 %521  ;;  %v4319_v52 = vld [vmem:[%s5481_s1 + $0x50] sm:$0xff] }
 0x2ce   :  { %v658_v58 = vadd.f32 %v4210_v53, %v489_v51  ;;  %v657_v59 = vadd.f32 %v4210_v53, %v486_v46  ;;  %v660_v60 = vadd.f32 %v4210_v53, %v495_v48  ;;  %v659_v61 = vadd.f32 %v4210_v53, %v492_v43  ;;  %v525_v48 = vpop.xlane.xlu1 %524  ;;  %v4314_v51 = vld [vmem:[%s5481_s1 + $0x58] sm:$0xff] }
 0x2cf   :  { %v662_v0 = vadd.f32 %v4210_v53, %v501_v56  ;;  %v661_v1 = vadd.f32 %v4210_v53, %v498_v57  ;;  %v664_v15 = vadd.f32 %v4210_v53, %v507_v4  ;;  %v663_v18 = vadd.f32 %v4210_v53, %v504_v7 }
 0x2d0   :  { %vm674_vm9 = vcmp.gt.f32.partialorder %v658_v58, 0.0  ;;  %v690_v2 = vmul.f32 0.2, %v658_v58  ;;  %vm673_vm10 = vcmp.gt.f32.partialorder %v657_v59, 0.0  ;;  %v689_v3 = vmul.f32 0.2, %v657_v59 }
 0x2d1   :  { %vm676_vm11 = vcmp.gt.f32.partialorder %v660_v60, 0.0  ;;  %v692_v5 = vmul.f32 0.2, %v660_v60  ;;  %vm675_vm12 = vcmp.gt.f32.partialorder %v659_v61, 0.0  ;;  %v691_v6 = vmul.f32 0.2, %v659_v61 }
 0x2d2   :  { %v706_v8 = vsel %vm674_vm9, %v658_v58, %v690_v2  ;;  %v705_v9 = vsel %vm673_vm10, %v657_v59, %v689_v3  ;;  %v694_v14 = vmul.f32 0.2, %v662_v0  ;;  %vm678_vm15 = vcmp.gt.f32.partialorder %v662_v0, 0.0  ;;  %v528_v2 = vpop.xlane.xlu0 %527 }
 0x2d3   :  { %v4249_v12 = vsel %vm722_vm7, %v706_v8, -1e+30  ;;  %v4253_v13 = vsel %vm721_vm8, %v705_v9, -1e+30  ;;  %v708_v16 = vsel %vm676_vm11, %v660_v60, %v692_v5  ;;  %v707_v17 = vsel %vm675_vm12, %v659_v61, %v691_v6  ;;  %v4348_v8 = vld [vmem:[%s5481_s1 + $0x68] sm:$0xff]  ;;  %v4353_v9 = vld [vmem:[%s5481_s1 + $0x60] sm:$0xff] }
 0x2d4   :  { %755 = vmax.xlane.f32.xlu1 %v4249_v12  ;;  %753 = vmax.xlane.f32.xlu0 %v4253_v13  ;;  %vm677_vm0 = vcmp.gt.f32.partialorder %v661_v1, 0.0  ;;  %v693_v20 = vmul.f32 0.2, %v661_v1  ;;  %v4275_v24 = vsel %vm724_vm13, %v708_v16, -1e+30  ;;  %v710_v26 = vsel %vm678_vm15, %v662_v0, %v694_v14 }
 0x2d5   :  { %v4279_v25 = vsel %vm723_vm14, %v707_v17, -1e+30  ;;  %v696_v27 = vmul.f32 0.2, %v664_v15  ;;  %v695_v29 = vmul.f32 0.2, %v663_v18  ;;  %v666_v30 = vadd.f32 %v4210_v53, %v513_v19 }
 0x2d6   :  { %v709_v28 = vsel %vm677_vm0, %v661_v1, %v693_v20  ;;  %v665_v31 = vadd.f32 %v4210_v53, %v510_v21  ;;  %vm680_vm3 = vcmp.gt.f32.partialorder %v664_v15, 0.0  ;;  %vm679_vm7 = vcmp.gt.f32.partialorder %v663_v18, 0.0  ;;  %v531_v1 = vpop.xlane.xlu1 %530 }
 0x2d7   :  { %vm728_vm8 = vcmp.gt.f32.partialorder %v4266_v22, 0.0  ;;  %vm727_vm9 = vcmp.gt.f32.partialorder %v4271_v23, 0.0  ;;  %v4289_v34 = vsel %vm726_vm1, %v710_v26, -1e+30  ;;  %v4293_v35 = vsel %vm725_vm2, %v709_v28, -1e+30 }
 0x2d8   :  { %759 = vmax.xlane.f32.xlu1 %v4275_v24  ;;  %757 = vmax.xlane.f32.xlu0 %v4279_v25  ;;  %v668_v38 = vadd.f32 %v4210_v53, %v519_v32  ;;  %v667_v39 = vadd.f32 %v4210_v53, %v516_v33  ;;  %v712_v40 = vsel %vm680_vm3, %v664_v15, %v696_v27  ;;  %v698_v46 = vmul.f32 0.2, %v666_v30  ;;  %v4372_v26 = vld [vmem:[%s5481_s1 + $0x78] sm:$0xff]  ;;  %v4377_v27 = vld [vmem:[%s5481_s1 + $0x70] sm:$0xff] }
 0x2d9   :  { %v711_v43 = vsel %vm679_vm7, %v663_v18, %v695_v29  ;;  %v697_v47 = vmul.f32 0.2, %v665_v31  ;;  %vm682_vm10 = vcmp.gt.f32.partialorder %v666_v30, 0.0  ;;  %vm681_vm11 = vcmp.gt.f32.partialorder %v665_v31, 0.0 }
 0x2da   :  { %vm730_vm12 = vcmp.gt.f32.partialorder %v4298_v36, 0.0  ;;  %vm729_vm13 = vcmp.gt.f32.partialorder %v4303_v37, 0.0  ;;  %v670_v54 = vadd.f32 %v4210_v53, %v525_v48  ;;  %v4324_v56 = vsel %vm728_vm8, %v712_v40, -1e+30 }
 0x2db   :  { %v4328_v57 = vsel %vm727_vm9, %v711_v43, -1e+30  ;;  %v700_v58 = vmul.f32 0.2, %v668_v38  ;;  %v669_v59 = vadd.f32 %v4210_v53, %v522_v50  ;;  %v714_v60 = vsel %vm682_vm10, %v666_v30, %v698_v46 }
 0x2dc   :  { %763 = vmax.xlane.f32.xlu1 %v4289_v34  ;;  %761 = vmax.xlane.f32.xlu0 %v4293_v35  ;;  %v713_v61 = vsel %vm681_vm11, %v665_v31, %v697_v47  ;;  %vm684_vm14 = vcmp.gt.f32.partialorder %v668_v38, 0.0  ;;  %v699_v0 = vmul.f32 0.2, %v667_v39  ;;  %vm683_vm15 = vcmp.gt.f32.partialorder %v667_v39, 0.0 }
 0x2dd   :  { %vm732_vm0 = vcmp.gt.f32.partialorder %v4314_v51, 0.0  ;;  %vm731_vm1 = vcmp.gt.f32.partialorder %v4319_v52, 0.0  ;;  %v4337_v3 = vsel %vm730_vm12, %v714_v60, -1e+30  ;;  %v4341_v4 = vsel %vm729_vm13, %v713_v61, -1e+30 }
 0x2de   :  { %v716_v5 = vsel %vm684_vm14, %v668_v38, %v700_v58  ;;  %v702_v6 = vmul.f32 0.2, %v670_v54  ;;  %v715_v7 = vsel %vm683_vm15, %v667_v39, %v699_v0  ;;  %v701_v14 = vmul.f32 0.2, %v669_v59 }
 0x2df   :  { %v672_v15 = vadd.f32 %v4210_v53, %v531_v1  ;;  %v671_v16 = vadd.f32 %v4210_v53, %v528_v2  ;;  %vm686_vm2 = vcmp.gt.f32.partialorder %v670_v54, 0.0  ;;  %vm685_vm3 = vcmp.gt.f32.partialorder %v669_v59, 0.0 }
 0x2e0   :  { %767 = vmax.xlane.f32.xlu1 %v4324_v56  ;;  %765 = vmax.xlane.f32.xlu0 %v4328_v57  ;;  %v4359_v17 = vsel %vm732_vm0, %v716_v5, -1e+30  ;;  %v4363_v18 = vsel %vm731_vm1, %v715_v7, -1e+30  ;;  %vm734_vm7 = vcmp.gt.f32.partialorder %v4348_v8, 0.0  ;;  %vm733_vm8 = vcmp.gt.f32.partialorder %v4353_v9, 0.0 }
 0x2e1   :  { %v718_v19 = vsel %vm686_vm2, %v670_v54, %v702_v6  ;;  %v717_v53 = vsel %vm685_vm3, %v669_v59, %v701_v14  ;;  %v704_v20 = vmul.f32 0.2, %v672_v15  ;;  %v703_v21 = vmul.f32 0.2, %v671_v16 }
 0x2e2   :  { %vm688_vm9 = vcmp.gt.f32.partialorder %v672_v15, 0.0  ;;  %vm687_vm10 = vcmp.gt.f32.partialorder %v671_v16, 0.0  ;;  %v4379_v28 = vsel %vm734_vm7, %v718_v19, -1e+30  ;;  %v4381_v29 = vsel %vm733_vm8, %v717_v53, -1e+30 }
 0x2e3   :  { %v720_v30 = vsel %vm688_vm9, %v672_v15, %v704_v20  ;;  %vm736_vm11 = vcmp.gt.f32.partialorder %v4372_v26, 0.0  ;;  %v719_v31 = vsel %vm687_vm10, %v671_v16, %v703_v21  ;;  %vm735_vm12 = vcmp.gt.f32.partialorder %v4377_v27, 0.0 }
 0x2e4   :  { %771 = vmax.xlane.f32.xlu1 %v4337_v3  ;;  %769 = vmax.xlane.f32.xlu0 %v4341_v4  ;;  %v4387_v32 = vsel %vm736_vm11, %v720_v30, -1e+30  ;;  %v4389_v33 = vsel %vm735_vm12, %v719_v31, -1e+30 }
 0x2e8   :  { %775 = vmax.xlane.f32.xlu1 %v4359_v17  ;;  %773 = vmax.xlane.f32.xlu0 %v4363_v18 }
 0x2ec   :  { %779 = vmax.xlane.f32.xlu1 %v4379_v28  ;;  %777 = vmax.xlane.f32.xlu0 %v4381_v29 }
 0x2f0   :  { %783 = vmax.xlane.f32.xlu1 %v4387_v32  ;;  %781 = vmax.xlane.f32.xlu0 %v4389_v33 }
 0x361   :  { %v756_v38 = vpop.xlane.xlu1 %755  ;;  %v754_v39 = vpop.xlane.xlu0 %753 }
 0x362   :  { %v786_v40 = vsub.f32 %v4249_v12, %v756_v38  ;;  %v785_v43 = vsub.f32 %v4253_v13, %v754_v39 }
 0x364   :  { %v803_v46 = vmul.f32 1.442695, %v786_v40  ;;  %v801_v47 = vmul.f32 1.442695, %v785_v43 }
 0x365   :  { %v760_v48 = vpop.xlane.xlu1 %759  ;;  %v758_v50 = vpop.xlane.xlu0 %757 }
 0x366   :  { %3760 = vpow2.f32 %v803_v46  ;;  %v788_v54 = vsub.f32 %v4275_v24, %v760_v48  ;;  %v787_v58 = vsub.f32 %v4279_v25, %v758_v50 }
 0x367   :  { %3762 = vpow2.f32 %v801_v47 }
 0x368   :  { %v807_v59 = vmul.f32 1.442695, %v788_v54  ;;  %v805_v60 = vmul.f32 1.442695, %v787_v58 }
 0x369   :  { %v764_v61 = vpop.xlane.xlu1 %763  ;;  %v762_v0 = vpop.xlane.xlu0 %761 }
 0x36a   :  { %3764 = vpow2.f32 %v807_v59  ;;  %v790_v1 = vsub.f32 %v4289_v34, %v764_v61  ;;  %v789_v12 = vsub.f32 %v4293_v35, %v762_v0 }
 0x36b   :  { %3766 = vpow2.f32 %v805_v60 }
 0x36c   :  { %v811_v13 = vmul.f32 1.442695, %v790_v1  ;;  %v809_v2 = vmul.f32 1.442695, %v789_v12 }
 0x36d   :  { %v768_v5 = vpop.xlane.xlu1 %767  ;;  %v766_v6 = vpop.xlane.xlu0 %765 }
 0x36e   :  { %3768 = vpow2.f32 %v811_v13  ;;  %v792_v24 = vsub.f32 %v4324_v56, %v768_v5  ;;  %v791_v25 = vsub.f32 %v4328_v57, %v766_v6 }
 0x36f   :  { %3770 = vpow2.f32 %v809_v2 }
 0x370   :  { %v3761_v7 = vpop.eup %3760  ;;  %v815_v14 = vmul.f32 1.442695, %v792_v24  ;;  %v813_v15 = vmul.f32 1.442695, %v791_v25 }
 0x371   :  { %v3763_v16 = vpop.eup %3762  ;;  %v772_v19 = vpop.xlane.xlu1 %771  ;;  %v4402_v34 = vmul.f32 %v3761_v7, %v4215_v55 }
 0x372   :  { %v770_v53 = vpop.xlane.xlu0 %769  ;;  %3772 = vpow2.f32 %v815_v14  ;;  %v794_v35 = vsub.f32 %v4337_v3, %v772_v19  ;;  %v4407_v21 = vmul.f32 %v3763_v16, %v4206_v41 }
 0x373   :  { %v793_v20 = vsub.f32 %v4341_v4, %v770_v53  ;;  %3774 = vpow2.f32 %v813_v15  ;;  %851 = vadd.xlane.f32.xlu1 %v4402_v34 }
 0x374   :  { %v3765_v56 = vpop.eup %3764  ;;  %v819_v57 = vmul.f32 1.442695, %v794_v35  ;;  %849 = vadd.xlane.f32.xlu0 %v4407_v21 }
 0x375   :  { %v817_v30 = vmul.f32 1.442695, %v793_v20  ;;  %v3767_v31 = vpop.eup %3766  ;;  %v776_v38 = vpop.xlane.xlu1 %775  ;;  %v4412_v40 = vmul.f32 %v3765_v56, %v4226_v62 }
 0x376   :  { %v774_v39 = vpop.xlane.xlu0 %773  ;;  %3776 = vpow2.f32 %v819_v57  ;;  %v796_v3 = vsub.f32 %v4359_v17, %v776_v38  ;;  %v4417_v43 = vmul.f32 %v3767_v31, %v4231_v63 }
 0x377   :  { %v795_v4 = vsub.f32 %v4363_v18, %v774_v39  ;;  %3778 = vpow2.f32 %v817_v30  ;;  %855 = vadd.xlane.f32.xlu1 %v4412_v40 }
 0x378   :  { %v3769_v46 = vpop.eup %3768  ;;  %v823_v47 = vmul.f32 1.442695, %v796_v3  ;;  %853 = vadd.xlane.f32.xlu0 %v4417_v43 }
 0x379   :  { %v821_v48 = vmul.f32 1.442695, %v795_v4  ;;  %v3771_v50 = vpop.eup %3770  ;;  %v780_v54 = vpop.xlane.xlu1 %779  ;;  %v4422_v59 = vmul.f32 %v3769_v46, %v4240_v10 }
 0x37a   :  { %v778_v58 = vpop.xlane.xlu0 %777  ;;  %3780 = vpow2.f32 %v823_v47  ;;  %v798_v17 = vsub.f32 %v4379_v28, %v780_v54  ;;  %v4427_v60 = vmul.f32 %v3771_v50, %v4245_v11 }
 0x37b   :  { %v797_v18 = vsub.f32 %v4381_v29, %v778_v58  ;;  %3782 = vpow2.f32 %v821_v48  ;;  %859 = vadd.xlane.f32.xlu1 %v4422_v59 }
 0x37c   :  { %v3773_v61 = vpop.eup %3772  ;;  %v827_v0 = vmul.f32 1.442695, %v798_v17  ;;  %857 = vadd.xlane.f32.xlu0 %v4427_v60 }
 0x37d   :  { %v825_v1 = vmul.f32 1.442695, %v797_v18  ;;  %v3775_v12 = vpop.eup %3774  ;;  %v784_v13 = vpop.xlane.xlu1 %783  ;;  %v4432_v5 = vmul.f32 %v3773_v61, %v4266_v22 }
 0x37e   :  { %v782_v2 = vpop.xlane.xlu0 %781  ;;  %3784 = vpow2.f32 %v827_v0  ;;  %v800_v28 = vsub.f32 %v4387_v32, %v784_v13  ;;  %v4437_v6 = vmul.f32 %v3775_v12, %v4271_v23 }
 0x37f   :  { %v799_v29 = vsub.f32 %v4389_v33, %v782_v2  ;;  %3786 = vpow2.f32 %v825_v1  ;;  %863 = vadd.xlane.f32.xlu1 %v4432_v5 }
 0x380   :  { %v3777_v24 = vpop.eup %3776  ;;  %v831_v25 = vmul.f32 1.442695, %v800_v28  ;;  %861 = vadd.xlane.f32.xlu0 %v4437_v6 }
 0x381   :  { %v829_v7 = vmul.f32 1.442695, %v799_v29  ;;  %v3779_v14 = vpop.eup %3778  ;;  %v4442_v15 = vmul.f32 %v3777_v24, %v4298_v36 }
 0x382   :  { %3788 = vpow2.f32 %v831_v25  ;;  %v4445_v32 = vmul.f32 %v3779_v14, %v4303_v37 }
 0x383   :  { %3790 = vpow2.f32 %v829_v7  ;;  %867 = vadd.xlane.f32.xlu1 %v4442_v15 }
 0x384   :  { %v3781_v33 = vpop.eup %3780  ;;  %865 = vadd.xlane.f32.xlu0 %v4445_v32 }
 0x385   :  { %v3783_v16 = vpop.eup %3782  ;;  %v4450_v19 = vmul.f32 %v3781_v33, %v4314_v51 }
 0x386   :  { %v4453_v53 = vmul.f32 %v3783_v16, %v4319_v52 }
 0x387   :  { %871 = vadd.xlane.f32.xlu1 %v4450_v19 }
 0x388   :  { %v3785_v35 = vpop.eup %3784  ;;  %869 = vadd.xlane.f32.xlu0 %v4453_v53 }
 0x389   :  { %v3787_v20 = vpop.eup %3786  ;;  %v4458_v56 = vmul.f32 %v3785_v35, %v4348_v8 }
 0x38a   :  { %v4461_v57 = vmul.f32 %v3787_v20, %v4353_v9 }
 0x38b   :  { %875 = vadd.xlane.f32.xlu1 %v4458_v56 }
 0x38c   :  { %v3789_v30 = vpop.eup %3788  ;;  %873 = vadd.xlane.f32.xlu0 %v4461_v57 }
 0x38d   :  { %v3791_v31 = vpop.eup %3790  ;;  %v4466_v38 = vmul.f32 %v3789_v30, %v4372_v26 }
 0x38e   :  { %v4469_v39 = vmul.f32 %v3791_v31, %v4377_v27 }
 0x38f   :  { %879 = vadd.xlane.f32.xlu1 %v4466_v38 }
 0x390   :  { %877 = vadd.xlane.f32.xlu0 %v4469_v39 }
 0x393   :  { %1273 = vadd.xlane.f32.xlu1 %v4215_v55  ;;  %v26_v55 = vld [vmem:[%s5479_s3 + $0x48] sm:$0xff] }
 0x394   :  { %1271 = vadd.xlane.f32.xlu0 %v4206_v41  ;;  %v25_v41 = vld [vmem:[%s5479_s3 + $0x40] sm:$0xff] }
 0x397   :  { %1277 = vadd.xlane.f32.xlu1 %v4226_v62  ;;  %v3640_v62 = vpack.c.bf16 %v26_v55, %v25_v41 }
 0x398   :  { %1275 = vadd.xlane.f32.xlu0 %v4231_v63 }
 0x399   :  { %3641 = vmatprep.subr.bf16.mxu1 %v3640_v62 }
 0x39b   :  { %1281 = vadd.xlane.f32.xlu1 %v4240_v10 }
 0x39c   :  { %1279 = vadd.xlane.f32.xlu0 %v4245_v11 }
 0x39f   :  { %1285 = vadd.xlane.f32.xlu1 %v4266_v22 }
 0x3a0   :  { %1283 = vadd.xlane.f32.xlu0 %v4271_v23 }
 0x3a3   :  { %1289 = vadd.xlane.f32.xlu1 %v4298_v36 }
 0x3a4   :  { %1287 = vadd.xlane.f32.xlu0 %v4303_v37 }
 0x3a7   :  { %1293 = vadd.xlane.f32.xlu1 %v4314_v51  ;;  %v27_v51 = vld [vmem:[%s5479_s3 + $0x50] sm:$0xff] }
 0x3a8   :  { %1291 = vadd.xlane.f32.xlu0 %v4319_v52  ;;  %v28_v52 = vld [vmem:[%s5479_s3 + $0x58] sm:$0xff] }
 0x3a9   :  { %v3644_v50 = vpack.c.bf16 %v28_v52, %v27_v51 }
 0x3ab   :  { %1297 = vadd.xlane.f32.xlu1 %v4348_v8 }
 0x3ac   :  { %1295 = vadd.xlane.f32.xlu0 %v4353_v9 }
 0x3af   :  { %1301 = vadd.xlane.f32.xlu1 %v4372_v26 }
 0x3b0   :  { %1299 = vadd.xlane.f32.xlu0 %v4377_v27 }
 0x400   :  { %v852_v63 = vpop.xlane.xlu1 %851 }
 0x401   :  { %3792 = vrcp.f32 %v852_v63  ;;  %v850_v10 = vpop.xlane.xlu0 %849 }
 0x402   :  { %3794 = vrcp.f32 %v850_v10 }
 0x404   :  { %v856_v11 = vpop.xlane.xlu1 %855 }
 0x405   :  { %3796 = vrcp.f32 %v856_v11  ;;  %v854_v22 = vpop.xlane.xlu0 %853 }
 0x406   :  { %3798 = vrcp.f32 %v854_v22 }
 0x408   :  { %v860_v23 = vpop.xlane.xlu1 %859 }
 0x409   :  { %3800 = vrcp.f32 %v860_v23  ;;  %v858_v36 = vpop.xlane.xlu0 %857 }
 0x40a   :  { %3802 = vrcp.f32 %v858_v36 }
 0x40b   :  { %v3793_v37 = vpop.eup %3792 }
 0x40c   :  { %v3795_v3 = vpop.eup %3794  ;;  %v864_v4 = vpop.xlane.xlu1 %863  ;;  %v884_v46 = vmul.f32 %v3793_v37, %v4402_v34 }
 0x40d   :  { %3804 = vrcp.f32 %v864_v4  ;;  %v862_v47 = vpop.xlane.xlu0 %861  ;;  %v882_v48 = vmul.f32 %v3795_v3, %v4407_v21 }
 0x40e   :  { %3806 = vrcp.f32 %v862_v47 }
 0x40f   :  { %v3797_v54 = vpop.eup %3796  ;;  %3299 = vmatprep.mubr.f32.mxu1 %v882_v48 }
 0x410   :  { %v3799_v58 = vpop.eup %3798  ;;  %3300 = vmatmul.mubr.f32.vlgmr.msra.gmra.mrb[16].mxu1 %v884_v46  ;;  %v868_v17 = vpop.xlane.xlu1 %867  ;;  %v888_v18 = vmul.f32 %v3797_v54, %v4412_v40 }
 0x411   :  { %3808 = vrcp.f32 %v868_v17  ;;  %v866_v61 = vpop.xlane.xlu0 %865  ;;  %v886_v0 = vmul.f32 %v3799_v58, %v4417_v43  ;;  %3643 = vmatpush3.bf16.msra.mxu1 %v3640_v62 }
 0x412   :  { %3810 = vrcp.f32 %v866_v61  ;;  %3645 = vmatprep.subr.bf16.mxu1 %v3644_v50 }
 0x413   :  { %v3801_v34 = vpop.eup %3800  ;;  %3302 = vmatprep.mubr.f32.mxu1 %v886_v0 }
 0x414   :  { %v3803_v1 = vpop.eup %3802  ;;  %3303 = vmatmul.mubr.f32.gmra.mrb[18].mxu1 %v888_v18  ;;  %v872_v21 = vpop.xlane.xlu1 %871  ;;  %v892_v12 = vmul.f32 %v3801_v34, %v4422_v59 }
 0x415   :  { %3812 = vrcp.f32 %v872_v21  ;;  %v870_v13 = vpop.xlane.xlu0 %869  ;;  %v890_v2 = vmul.f32 %v3803_v1, %v4427_v60  ;;  %3647 = vmatpush3.bf16.msra.mxu1 %v3644_v50 }
 0x416   :  { %3814 = vrcp.f32 %v870_v13 }
 0x417   :  { %v3805_v40 = vpop.eup %3804  ;;  %3305 = vmatprep.mubr.f32.mxu1 %v890_v2 }
 0x418   :  { %v3807_v28 = vpop.eup %3806  ;;  %3306 = vmatmul.mubr.f32.gmra.mrb[20].mxu1 %v892_v12  ;;  %v876_v43 = vpop.xlane.xlu1 %875  ;;  %v896_v29 = vmul.f32 %v3805_v40, %v4432_v5 }
 0x419   :  { %3816 = vrcp.f32 %v876_v43  ;;  %v874_v24 = vpop.xlane.xlu0 %873  ;;  %v894_v25 = vmul.f32 %v3807_v28, %v4437_v6 }
 0x41a   :  { %3818 = vrcp.f32 %v874_v24 }
 0x41b   :  { %v3809_v7 = vpop.eup %3808  ;;  %3308 = vmatprep.mubr.f32.mxu1 %v894_v25 }
 0x41c   :  { %v3811_v59 = vpop.eup %3810  ;;  %3309 = vmatmul.mubr.f32.gmra.mrb[22].mxu1 %v896_v29  ;;  %v880_v14 = vpop.xlane.xlu1 %879  ;;  %v900_v60 = vmul.f32 %v3809_v7, %v4442_v15 }
 0x41d   :  { %3820 = vrcp.f32 %v880_v14  ;;  %v878_v33 = vpop.xlane.xlu0 %877  ;;  %v898_v16 = vmul.f32 %v3811_v59, %v4445_v32 }
 0x41e   :  { %3822 = vrcp.f32 %v878_v33 }
 0x41f   :  { %v3813_v35 = vpop.eup %3812  ;;  %3311 = vmatprep.mubr.f32.mxu1 %v898_v16 }
 0x420   :  { %v3815_v5 = vpop.eup %3814  ;;  %3312 = vmatmul.mubr.f32.gmra.mrb[24].mxu1 %v900_v60  ;;  %v904_v20 = vmul.f32 %v3813_v35, %v4450_v19  ;;  %v2826_v19 = vld [vmem:[%s5479_s3 + $0x80] ss:$0 sm:$0xff] }
 0x421   :  { %v902_v6 = vmul.f32 %v3815_v5, %v4453_v53 }
 0x423   :  { %v3817_v30 = vpop.eup %3816  ;;  %3314 = vmatprep.mubr.f32.mxu1 %v902_v6 }
 0x424   :  { %v3819_v31 = vpop.eup %3818  ;;  %3315 = vmatmul.mubr.f32.gmra.mrb[26].mxu1 %v904_v20  ;;  %v908_v41 = vmul.f32 %v3817_v30, %v4458_v56 }
 0x425   :  { %v906_v15 = vmul.f32 %v3819_v31, %v4461_v57  ;;  %v3999_v31 = vmov 0  }
 0x426   :  { %3759 = vset.pattern.permute.xlu1 %v3999_v31  ;;  %3758 = vset.pattern.permute.xlu0 %v3999_v31 }
 0x427   :  { %v3821_v55 = vpop.eup %3820  ;;  %3317 = vmatprep.mubr.f32.mxu1 %v906_v15  ;;  %v1518_v15 = vld [vmem:[%s5482_s2 + $0x10] sm:$0xff] }
 0x428   :  { %v3823_v32 = vpop.eup %3822  ;;  %3318 = vmatmul.mubr.f32.gmra.mrb[28].mxu1 %v908_v41  ;;  %v912_v62 = vmul.f32 %v3821_v55, %v4466_v38  ;;  %v1517_v41 = vld [vmem:[%s5482_s2 + $0x8] sm:$0xff]  ;;  %v1516_v55 = vld [vmem:[%s5482_s2] sm:$0xff] }
 0x429   :  { %v910_v63 = vmul.f32 %v3823_v32, %v4469_v39  ;;  %1554 = vperm.xlu1 %3759, %v1517_v41   ;;  %1551 = vperm.xlu0 %3758, %v1516_v55   ;;  %v1525_v32 = vld [vmem:[%s5482_s2 + $0x48] sm:$0xff] }
 0x42b   :  { %3320 = vmatprep.mubr.f32.mxu1 %v910_v63  ;;  %v1527_v63 = vld [vmem:[%s5482_s2 + $0x58] sm:$0xff] }
 0x42c   :  { %3321 = vmatmul.mubr.f32.gmra.mrb[30].mxu1 %v912_v62  ;;  %v1519_v62 = vld [vmem:[%s5482_s2 + $0x18] sm:$0xff] }
 0x42d   :  { %1557 = vperm.xlu1 %3759, %v1518_v15   ;;  %1578 = vperm.xlu0 %3758, %v1525_v32  }
 0x431   :  { %1560 = vperm.xlu1 %3759, %v1519_v62   ;;  %1584 = vperm.xlu0 %3758, %v1527_v63  }
 0x4e3   :  { %v3301_v53 = vpop.f32.mrb[16].mxu1 }
 0x4e4   :  { %v989_v10 = vadd.f32 %v3301_v53, %v2826_v19  ;;  %v983_v11 = vpop.f32.mrb[17].mxu1  ;;  %v1529_v53 = vld [vmem:[%s5482_s2 + $0x68] sm:$0xff] }
 0x4e5   :  { %v984_v56 = vadd.f32 %v2826_v19, %v983_v11  ;;  %1590 = vperm.xlu0 %3758, %v1529_v53   ;;  %v1531_v11 = vld [vmem:[%s5482_s2 + $0x78] sm:$0xff] }
 0x4e6   :  { %v1063_v23 = vmax.f32 %v989_v10, 0.0  ;;  %v1521_v10 = vld [vmem:[%s5482_s2 + $0x28] sm:$0xff] }
 0x4e7   :  { %v1062_v22 = vmax.f32 %v984_v56, 0.0  ;;  %v3304_v57 = vpop.f32.mrb[18].mxu1  ;;  %v1522_v56 = vld [vmem:[%s5482_s2 + $0x30] sm:$0xff] }
 0x4e8   :  { %v999_v36 = vadd.f32 %v3304_v57, %v2826_v19  ;;  %v993_v37 = vpop.f32.mrb[19].mxu1  ;;  %v1523_v57 = vld [vmem:[%s5482_s2 + $0x38] sm:$0xff] }
 0x4e9   :  { %v994_v51 = vadd.f32 %v2826_v19, %v993_v37  ;;  %3331 = vmatprep.mubr.msk.f32.mxu1 %vm270_vm4, %v1062_v22  ;;  %1596 = vperm.xlu0 %3758, %v1531_v11   ;;  %v1533_v22 = vld [vmem:[%s5482_s2 + $0x88] sm:$0xff] }
 0x4ea   :  { %3332 = vmatmul.mubr.msk.f32.vlgmr.msra.gmra.mrb[32].mxu1 %vm270_vm4, %v1063_v23  ;;  %v1065_v52 = vmax.f32 %v999_v36, 0.0  ;;  %v1535_v23 = vld [vmem:[%s5482_s2 + $0x98] sm:$0xff]  ;;  %v1524_v36 = vld [vmem:[%s5482_s2 + $0x40] sm:$0xff]  ;;  %v1537_v37 = vld [vmem:[%s5482_s2 + $0xa8] sm:$0xff] }
 0x4eb   :  { %v1064_v38 = vmax.f32 %v994_v51, 0.0  ;;  %v3307_v39 = vpop.f32.mrb[20].mxu1  ;;  %v1526_v51 = vld [vmem:[%s5482_s2 + $0x50] sm:$0xff] }
 0x4ec   :  { %v1009_v3 = vadd.f32 %v3307_v39, %v2826_v19  ;;  %v1003_v4 = vpop.f32.mrb[21].mxu1  ;;  %v1272_v39 = vpop.xlane.xlu0 %1271 }
 0x4ed   :  { %v1004_v46 = vadd.f32 %v2826_v19, %v1003_v4  ;;  %3334 = vmatprep.mubr.msk.f32.mxu1 %vm270_vm4, %v1064_v38  ;;  %1602 = vperm.xlu0 %3758, %v1533_v22   ;;  %v1274_v38 = vpop.xlane.xlu1 %1273  ;;  %v1541_v4 = vld [vmem:[%s5482_s2 + $0xc8] sm:$0xff] }
 0x4ee   :  { %3335 = vmatmul.mubr.msk.f32.gmra.mrb[34].mxu1 %vm270_vm4, %v1065_v52  ;;  %v1067_v50 = vmax.f32 %v1009_v3, 0.0  ;;  %v1539_v52 = vld [vmem:[%s5482_s2 + $0xb8] sm:$0xff]  ;;  %v1528_v3 = vld [vmem:[%s5482_s2 + $0x60] sm:$0xff]  ;;  %3824 = vrsqrt.f32 %v1274_v38 }
 0x4ef   :  { %v1066_v47 = vmax.f32 %v1004_v46, 0.0  ;;  %v3310_v48 = vpop.f32.mrb[22].mxu1  ;;  %3826 = vrsqrt.f32 %v1272_v39 }
 0x4f0   :  { %v1019_v54 = vadd.f32 %v3310_v48, %v2826_v19  ;;  %v1013_v58 = vpop.f32.mrb[23].mxu1  ;;  %v1276_v48 = vpop.xlane.xlu0 %1275 }
 0x4f1   :  { %v1014_v17 = vadd.f32 %v2826_v19, %v1013_v58  ;;  %3337 = vmatprep.mubr.msk.f32.mxu1 %vm270_vm4, %v1066_v47  ;;  %1608 = vperm.xlu0 %3758, %v1535_v23   ;;  %v1278_v46 = vpop.xlane.xlu1 %1277  ;;  %v1530_v47 = vld [vmem:[%s5482_s2 + $0x70] sm:$0xff] }
 0x4f2   :  { %3338 = vmatmul.mubr.msk.f32.gmra.mrb[36].mxu1 %vm270_vm4, %v1067_v50  ;;  %v1069_v0 = vmax.f32 %v1019_v54, 0.0  ;;  %v1543_v50 = vld [vmem:[%s5482_s2 + $0xd8] sm:$0xff]  ;;  %v1532_v54 = vld [vmem:[%s5482_s2 + $0x80] sm:$0xff]  ;;  %3828 = vrsqrt.f32 %v1278_v46 }
 0x4f3   :  { %v1068_v18 = vmax.f32 %v1014_v17, 0.0  ;;  %v3313_v61 = vpop.f32.mrb[24].mxu1  ;;  %3830 = vrsqrt.f32 %v1276_v48 }
 0x4f4   :  { %v1029_v34 = vadd.f32 %v3313_v61, %v2826_v19  ;;  %v1023_v1 = vpop.f32.mrb[25].mxu1  ;;  %v1280_v17 = vpop.xlane.xlu0 %1279  ;;  %v1534_v61 = vld [vmem:[%s5482_s2 + $0x90] sm:$0xff] }
 0x4f5   :  { %v1024_v21 = vadd.f32 %v2826_v19, %v1023_v1  ;;  %3340 = vmatprep.mubr.msk.f32.mxu1 %vm270_vm4, %v1068_v18  ;;  %1614 = vperm.xlu0 %3758, %v1537_v37   ;;  %v1282_v58 = vpop.xlane.xlu1 %1281  ;;  %v1545_v18 = vld [vmem:[%s5482_s2 + $0xe8] sm:$0xff]  ;;  %v1536_v1 = vld [vmem:[%s5482_s2 + $0xa0] sm:$0xff] }
 0x4f6   :  { %3341 = vmatmul.mubr.msk.f32.gmra.mrb[38].mxu1 %vm270_vm4, %v1069_v0  ;;  %v1071_v2 = vmax.f32 %v1029_v34, 0.0  ;;  %v1547_v0 = vld [vmem:[%s5482_s2 + $0xf8] sm:$0xff]  ;;  %3832 = vrsqrt.f32 %v1282_v58 }
 0x4f7   :  { %v1070_v12 = vmax.f32 %v1024_v21, 0.0  ;;  %v3316_v13 = vpop.f32.mrb[26].mxu1  ;;  %3834 = vrsqrt.f32 %v1280_v17 }
 0x4f8   :  { %v1039_v40 = vadd.f32 %v3316_v13, %v2826_v19  ;;  %v1033_v28 = vpop.f32.mrb[27].mxu1  ;;  %v1284_v21 = vpop.xlane.xlu0 %1283 }
 0x4f9   :  { %v1034_v43 = vadd.f32 %v2826_v19, %v1033_v28  ;;  %3343 = vmatprep.mubr.msk.f32.mxu1 %vm270_vm4, %v1070_v12  ;;  %1620 = vperm.xlu0 %3758, %v1539_v52   ;;  %v1286_v34 = vpop.xlane.xlu1 %1285  ;;  %v1538_v12 = vld [vmem:[%s5482_s2 + $0xb0] sm:$0xff]  ;;  %v4623_v28 = vpop.eup %3824 }
 0x4fa   :  { %3344 = vmatmul.mubr.msk.f32.gmra.mrb[40].mxu1 %vm270_vm4, %v1071_v2  ;;  %v1073_v25 = vmax.f32 %v1039_v40, 0.0  ;;  %v1540_v40 = vld [vmem:[%s5482_s2 + $0xc0] sm:$0xff]  ;;  %3836 = vrsqrt.f32 %v1286_v34 }
 0x4fb   :  { %v1072_v29 = vmax.f32 %v1034_v43, 0.0  ;;  %v3319_v24 = vpop.f32.mrb[28].mxu1  ;;  %v4625_v43 = vpop.eup %3826  ;;  %3838 = vrsqrt.f32 %v1284_v21 }
 0x4fc   :  { %v1049_v7 = vadd.f32 %v3319_v24, %v2826_v19  ;;  %v1043_v59 = vpop.f32.mrb[29].mxu1  ;;  %v1288_v2 = vpop.xlane.xlu0 %1287 }
 0x4fd   :  { %v1044_v14 = vadd.f32 %v2826_v19, %v1043_v59  ;;  %3346 = vmatprep.mubr.msk.f32.mxu1 %vm270_vm4, %v1072_v29  ;;  %1626 = vperm.xlu0 %3758, %v1541_v4   ;;  %v1290_v13 = vpop.xlane.xlu1 %1289  ;;  %v1542_v59 = vld [vmem:[%s5482_s2 + $0xd0] sm:$0xff] }
 0x4fe   :  { %3347 = vmatmul.mubr.msk.f32.gmra.mrb[42].mxu1 %vm270_vm4, %v1073_v25  ;;  %v1075_v16 = vmax.f32 %v1049_v7, 0.0  ;;  %3840 = vrsqrt.f32 %v1290_v13 }
 0x4ff   :  { %v1074_v60 = vmax.f32 %v1044_v14, 0.0  ;;  %v3322_v33 = vpop.f32.mrb[30].mxu1  ;;  %v4631_v14 = vpop.eup %3828  ;;  %3842 = vrsqrt.f32 %v1288_v2 }
 0x500   :  { %v1059_v35 = vadd.f32 %v3322_v33, %v2826_v19  ;;  %v1053_v5 = vpop.f32.mrb[31].mxu1  ;;  %v1292_v33 = vpop.xlane.xlu0 %1291 }
 0x501   :  { %v1054_v20 = vadd.f32 %v2826_v19, %v1053_v5  ;;  %3349 = vmatprep.mubr.msk.f32.mxu1 %vm270_vm4, %v1074_v60  ;;  %v1520_v19 = vld [vmem:[%s5482_s2 + $0x20] sm:$0xff]  ;;  %1632 = vperm.xlu0 %3758, %v1543_v50   ;;  %v1294_v7 = vpop.xlane.xlu1 %1293 }
 0x502   :  { %3350 = vmatmul.mubr.msk.f32.gmra.mrb[44].mxu1 %vm270_vm4, %v1075_v16  ;;  %v1077_v30 = vmax.f32 %v1059_v35, 0.0  ;;  %1563 = vperm.xlu1 %3759, %v1520_v19   ;;  %v4634_v16 = vpop.eup %3830  ;;  %3844 = vrsqrt.f32 %v1294_v7 }
 0x503   :  { %v1076_v6 = vmax.f32 %v1054_v20, 0.0  ;;  %v4640_v31 = vpop.eup %3832  ;;  %3846 = vrsqrt.f32 %v1292_v33 }
 0x504   :  { %v4643_v15 = vpop.eup %3834  ;;  %v1296_v63 = vpop.xlane.xlu0 %1295 }
 0x505   :  { %3352 = vmatprep.mubr.msk.f32.mxu1 %vm270_vm4, %v1076_v6  ;;  %1638 = vperm.xlu0 %3758, %v1545_v18   ;;  %v1298_v55 = vpop.xlane.xlu1 %1297  ;;  %v4649_v11 = vpop.eup %3836 }
 0x506   :  { %3353 = vmatmul.mubr.msk.f32.gmra.mrb[46].mxu1 %vm270_vm4, %v1077_v30  ;;  %1566 = vperm.xlu1 %3759, %v1521_v10   ;;  %v1544_v30 = vld [vmem:[%s5482_s2 + $0xe0] sm:$0xff]  ;;  %v1546_v10 = vld [vmem:[%s5482_s2 + $0xf0] sm:$0xff]  ;;  %v4652_v22 = vpop.eup %3838  ;;  %3848 = vrsqrt.f32 %v1298_v55  ;;  %v3988_v55 = vld [vmem:[%s5481_s1 + $0x28] sm:$0xff] }
 0x507   :  { %3850 = vrsqrt.f32 %v1296_v63  ;;  %v3991_v63 = vld [vmem:[%s5481_s1 + $0x40] sm:$0xff] }
 0x508   :  { %v4655_v38 = vpop.eup %3840  ;;  %v1300_v52 = vpop.xlane.xlu0 %1299 }
 0x509   :  { %1644 = vperm.xlu0 %3758, %v1547_v0  }
 0x50a   :  { %1569 = vperm.xlu1 %3759, %v1522_v56  }
 0x50e   :  { %1572 = vperm.xlu1 %3759, %v1523_v57  }
 0x512   :  { %1575 = vperm.xlu1 %3759, %v1524_v36  }
 0x516   :  { %1581 = vperm.xlu1 %3759, %v1526_v51   ;;  %v1302_v51 = vpop.xlane.xlu1 %1301 }
 0x517   :  { %3852 = vrsqrt.f32 %v1302_v51 }
 0x518   :  { %3854 = vrsqrt.f32 %v1300_v52 }
 0x51a   :  { %1587 = vperm.xlu1 %3759, %v1528_v3   ;;  %v4658_v3 = vpop.eup %3842 }
 0x51b   :  { %v4661_v50 = vpop.eup %3844 }
 0x51c   :  { %v4664_v58 = vpop.eup %3846 }
 0x51d   :  { %v4667_v34 = vpop.eup %3848 }
 0x51e   :  { %1593 = vperm.xlu1 %3759, %v1530_v47   ;;  %v4670_v21 = vpop.eup %3850 }
 0x522   :  { %1599 = vperm.xlu1 %3759, %v1532_v54  }
 0x526   :  { %1605 = vperm.xlu1 %3759, %v1534_v61  }
 0x52a   :  { %1611 = vperm.xlu1 %3759, %v1536_v1  }
 0x52e   :  { %1617 = vperm.xlu1 %3759, %v1538_v12  }
 0x532   :  { %1623 = vperm.xlu1 %3759, %v1540_v40  }
 0x536   :  { %1629 = vperm.xlu1 %3759, %v1542_v59  }
 0x53a   :  { %1635 = vperm.xlu1 %3759, %v1544_v30   ;;  %v3986_v30 = vld [vmem:[%s5481_s1 + $0x18] sm:$0xff] }
 0x53e   :  { %1641 = vperm.xlu1 %3759, %v1546_v10   ;;  %v3994_v10 = vld [vmem:[%s5481_s1 + $0x58] sm:$0xff] }
 0x5bd   :  { %v3333_v29 = vpop.f32.mrb[32].mxu1 }
 0x5be   :  { %v1320_v24 = vmul.f32 %v4623_v28, %v3333_v29  ;;  %v1192_v25 = vpop.f32.mrb[33].mxu1  ;;  %v4673_v29 = vpop.eup %3852 }
 0x5bf   :  { %v1319_v60 = vmul.f32 %v4625_v43, %v1192_v25  ;;  %v4676_v25 = vpop.eup %3854 }
 0x5c1   :  { %v3648_v35 = vpack.c.bf16 %v1320_v24, %v1319_v60  ;;  %v3336_v5 = vpop.f32.mrb[34].mxu1 }
 0x5c2   :  { %v1322_v20 = vmul.f32 %v4631_v14, %v3336_v5  ;;  %v1202_v6 = vpop.f32.mrb[35].mxu1 }
 0x5c3   :  { %v1321_v41 = vmul.f32 %v4634_v16, %v1202_v6  ;;  %3649 = vmatprep.subr.bf16.mxu0 %v3648_v35  ;;  %v3985_v6 = vld [vmem:[%s5481_s1 + $0x10] sm:$0xff] }
 0x5c4   :  { %3651 = vmatpush3.bf16.msra.mxu0 %v3648_v35 }
 0x5c5   :  { %v3652_v32 = vpack.c.bf16 %v1322_v20, %v1321_v41  ;;  %v3339_v62 = vpop.f32.mrb[36].mxu1  ;;  %v3984_v20 = vld [vmem:[%s5481_s1 + $0x8] sm:$0xff]  ;;  %v3987_v41 = vld [vmem:[%s5481_s1 + $0x20] sm:$0xff] }
 0x5c6   :  { %v1324_v19 = vmul.f32 %v4640_v31, %v3339_v62  ;;  %v1212_v53 = vpop.f32.mrb[37].mxu1  ;;  %v3990_v62 = vld [vmem:[%s5481_s1 + $0x38] sm:$0xff] }
 0x5c7   :  { %v1323_v56 = vmul.f32 %v4643_v15, %v1212_v53  ;;  %3653 = vmatprep.subr.bf16.mxu0 %v3652_v32  ;;  %v3993_v53 = vld [vmem:[%s5481_s1 + $0x50] sm:$0xff] }
 0x5c8   :  { %3655 = vmatpush3.bf16.msra.mxu0 %v3652_v32  ;;  %v3989_v32 = vld [vmem:[%s5481_s1 + $0x30] sm:$0xff] }
 0x5c9   :  { %v3656_v57 = vpack.c.bf16 %v1324_v19, %v1323_v56  ;;  %v3342_v23 = vpop.f32.mrb[38].mxu1  ;;  %v3992_v19 = vld [vmem:[%s5481_s1 + $0x48] sm:$0xff]  ;;  %v4718_v56 = vand.u32 127, %v653_v42 }
 0x5ca   :  { %v1326_v36 = vmul.f32 %v4649_v11, %v3342_v23  ;;  %v1222_v37 = vpop.f32.mrb[39].mxu1  ;;  %v4000_v23 = vmov 1.0  }
 0x5cb   :  { %v1325_v39 = vmul.f32 %v4652_v22, %v1222_v37  ;;  %3657 = vmatprep.subr.bf16.mxu0 %v3656_v57 }
 0x5cc   :  { %3659 = vmatpush3.bf16.msra.mxu0 %v3656_v57  ;;  %v1552_v57 = vpop.permute.xlu0 %1551 }
 0x5cd   :  { %v3660_v4 = vpack.c.bf16 %v1326_v36, %v1325_v39  ;;  %v3345_v46 = vpop.f32.mrb[40].mxu1  ;;  %vm1646_vm13 = vcmp.eq.s32.totalorder %v4718_v56, %v1552_v57  ;;  %v4722_v36 = vpop.permute.xlu1 %1554 }
 0x5ce   :  { %v1328_v47 = vmul.f32 %v4655_v38, %v3345_v46  ;;  %v1232_v48 = vpop.f32.mrb[41].mxu1  ;;  %3443 = vmatprep.mubr.msk.f32.mxu1 %vm1646_vm13, %v4000_v23  ;;  %vm1647_vm14 = vcmp.eq.s32.totalorder %v4718_v56, %v4722_v36 }
 0x5cf   :  { %v1327_v54 = vmul.f32 %v4658_v3, %v1232_v48  ;;  %3661 = vmatprep.subr.bf16.mxu0 %v3660_v4 }
 0x5d0   :  { %3663 = vmatpush3.bf16.msra.mxu0 %v3660_v4 }
 0x5d1   :  { %v3664_v17 = vpack.c.bf16 %v1328_v47, %v1327_v54  ;;  %v3348_v18 = vpop.f32.mrb[42].mxu1  ;;  %v4724_v37 = vpop.permute.xlu1 %1557 }
 0x5d2   :  { %v1330_v61 = vmul.f32 %v4661_v50, %v3348_v18  ;;  %v1242_v0 = vpop.f32.mrb[43].mxu1  ;;  %vm1648_vm15 = vcmp.eq.s32.totalorder %v4718_v56, %v4724_v37 }
 0x5d3   :  { %v1329_v1 = vmul.f32 %v4664_v58, %v1242_v0  ;;  %3665 = vmatprep.subr.bf16.mxu0 %v3664_v17 }
 0x5d4   :  { %3667 = vmatpush3.bf16.msra.mxu0 %v3664_v17 }
 0x5d5   :  { %v3668_v12 = vpack.c.bf16 %v1330_v61, %v1329_v1  ;;  %v3351_v13 = vpop.f32.mrb[44].mxu1 }
 0x5d6   :  { %v1332_v2 = vmul.f32 %v4667_v34, %v3351_v13  ;;  %v1252_v40 = vpop.f32.mrb[45].mxu1 }
 0x5d7   :  { %v1331_v24 = vmul.f32 %v4670_v21, %v1252_v40  ;;  %3669 = vmatprep.subr.bf16.mxu0 %v3668_v12 }
 0x5d8   :  { %3671 = vmatpush3.bf16.msra.mxu0 %v3668_v12 }
 0x5d9   :  { %v3672_v7 = vpack.c.bf16 %v1332_v2, %v1331_v24  ;;  %v3354_v59 = vpop.f32.mrb[46].mxu1 }
 0x5da   :  { %v1334_v60 = vmul.f32 %v4673_v29, %v3354_v59  ;;  %v1262_v33 = vpop.f32.mrb[47].mxu1 }
 0x5db   :  { %v1333_v35 = vmul.f32 %v4676_v25, %v1262_v33  ;;  %3673 = vmatprep.subr.bf16.mxu0 %v3672_v7 }
 0x5dc   :  { %3675 = vmatpush3.bf16.msra.mxu0 %v3672_v7 }
 0x5dd   :  { %v3676_v5 = vpack.c.bf16 %v1334_v60, %v1333_v35 }
 0x5df   :  { %3677 = vmatprep.subr.bf16.mxu0 %v3676_v5 }
 0x5e0   :  { %3679 = vmatpush3.bf16.msra.mxu0 %v3676_v5 }
 0x5e3   :  { %3388 = vmatmul.mubr.f32.vlgmr.msra.gmra.mrb[18].mxu0 %v3984_v20 }
 0x5e4   :  { %3390 = vmatprep.mubr.f32.mxu0 %v3985_v6 }
 0x5e7   :  { %3391 = vmatmul.mubr.f32.gmra.mrb[20].mxu0 %v3986_v30 }
 0x5e8   :  { %3393 = vmatprep.mubr.f32.mxu0 %v3987_v41 }
 0x5eb   :  { %3394 = vmatmul.mubr.f32.gmra.mrb[22].mxu0 %v3988_v55 }
 0x5ec   :  { %3396 = vmatprep.mubr.f32.mxu0 %v3989_v32 }
 0x5ef   :  { %3397 = vmatmul.mubr.f32.gmra.mrb[24].mxu0 %v3990_v62 }
 0x5f0   :  { %3399 = vmatprep.mubr.f32.mxu0 %v3991_v63 }
 0x5f3   :  { %3400 = vmatmul.mubr.f32.gmra.mrb[26].mxu0 %v3992_v19 }
 0x5f4   :  { %3402 = vmatprep.mubr.f32.mxu0 %v3993_v53 }
 0x5f7   :  { %3403 = vmatmul.mubr.f32.gmra.mrb[28].mxu0 %v3994_v10 }
 0x5f8   :  { %3405 = vmatprep.mubr.f32.mxu0 %v4353_v9  ;;  %v4726_v9 = vpop.permute.xlu1 %1560 }
 0x5f9   :  { %vm1649_vm0 = vcmp.eq.s32.totalorder %v4718_v56, %v4726_v9 }
 0x5fb   :  { %3406 = vmatmul.mubr.f32.gmra.mrb[30].mxu0 %v4348_v8  ;;  %v4731_v8 = vld [vmem:[%s5479_s3 + $0x83] ss:$0 sm:$0xff] }
 0x5fc   :  { %3408 = vmatprep.mubr.f32.mxu0 %v4377_v27  ;;  %v4735_v39 = vpop.permute.xlu1 %1563 }
 0x5fd   :  { %vm1650_vm1 = vcmp.eq.s32.totalorder %v4718_v56, %v4735_v39 }
 0x5ff   :  { %3409 = vmatmul.mubr.f32.gmra.mrb[32].mxu0 %v4372_v26 }
 0x6b6   :  { %v3389_v26 = vpop.f32.mrb[18].mxu0 }
 0x6b7   :  { %v1481_v42 = vmul.f32 %v4623_v28, %v3389_v26  ;;  %v1401_v27 = vpop.f32.mrb[19].mxu0 }
 0x6b8   :  { %v1480_v51 = vmul.f32 %v4625_v43, %v1401_v27  ;;  %v4743_v43 = vpop.permute.xlu1 %1566 }
 0x6b9   :  { %v1501_v52 = vadd.f32 %v4731_v8, %v1481_v42  ;;  %vm1651_vm2 = vcmp.eq.s32.totalorder %v4718_v56, %v4743_v43 }
 0x6ba   :  { %v1500_v4 = vadd.f32 %v4731_v8, %v1480_v51  ;;  %v3392_v46 = vpop.f32.mrb[20].mxu0 }
 0x6bb   :  { %v1483_v47 = vmul.f32 %v4631_v14, %v3392_v46  ;;  %v1411_v48 = vpop.f32.mrb[21].mxu0 }
 0x6bc   :  { %v1482_v54 = vmul.f32 %v4634_v16, %v1411_v48  ;;  %v3680_v17 = vpack.c.bf16 %v1501_v52, %v1500_v4  ;;  %v4751_v60 = vpop.permute.xlu1 %1569  ;;  %v1579_v4 = vpop.permute.xlu0 %1578 }
 0x6bd   :  { %v1503_v18 = vadd.f32 %v4731_v8, %v1483_v47  ;;  %vm1652_vm3 = vcmp.eq.s32.totalorder %v4718_v56, %v4751_v60  ;;  %vm1655_vm9 = vcmp.eq.s32.totalorder %v4718_v56, %v1579_v4 }
 0x6be   :  { %v1502_v28 = vadd.f32 %v4731_v8, %v1482_v54  ;;  %v3395_v61 = vpop.f32.mrb[22].mxu0  ;;  %3681 = vmatprep.subr.bf16.mxu1 %v3680_v17 }
 0x6bf   :  { %v1485_v0 = vmul.f32 %v4640_v31, %v3395_v61  ;;  %v1421_v1 = vpop.f32.mrb[23].mxu0  ;;  %3683 = vmatpush3.bf16.msra.mxu1 %v3680_v17 }
 0x6c0   :  { %v1484_v12 = vmul.f32 %v4643_v15, %v1421_v1  ;;  %v3684_v13 = vpack.c.bf16 %v1503_v18, %v1502_v28  ;;  %v1573_v41 = vpop.permute.xlu1 %1572  ;;  %v1585_v17 = vpop.permute.xlu0 %1584 }
 0x6c1   :  { %v1505_v14 = vadd.f32 %v4731_v8, %v1485_v0  ;;  %vm1653_vm7 = vcmp.eq.s32.totalorder %v4718_v56, %v1573_v41  ;;  %vm1657_vm11 = vcmp.eq.s32.totalorder %v4718_v56, %v1585_v17 }
 0x6c2   :  { %v1504_v16 = vadd.f32 %v4731_v8, %v1484_v12  ;;  %v3398_v2 = vpop.f32.mrb[24].mxu0  ;;  %3685 = vmatprep.subr.bf16.mxu1 %v3684_v13 }
 0x6c3   :  { %v1487_v40 = vmul.f32 %v4649_v11, %v3398_v2  ;;  %v1431_v24 = vpop.f32.mrb[25].mxu0  ;;  %3687 = vmatpush3.bf16.msra.mxu1 %v3684_v13 }
 0x6c4   :  { %v1486_v7 = vmul.f32 %v4652_v22, %v1431_v24  ;;  %v3688_v59 = vpack.c.bf16 %v1505_v14, %v1504_v16  ;;  %v1576_v42 = vpop.permute.xlu1 %1575 }
 0x6c5   :  { %v1507_v31 = vadd.f32 %v4731_v8, %v1487_v40  ;;  %vm1654_vm8 = vcmp.eq.s32.totalorder %v4718_v56, %v1576_v42 }
 0x6c6   :  { %v1506_v15 = vadd.f32 %v4731_v8, %v1486_v7  ;;  %v3401_v33 = vpop.f32.mrb[26].mxu0  ;;  %3689 = vmatprep.subr.bf16.mxu1 %v3688_v59 }
 0x6c7   :  { %v1489_v35 = vmul.f32 %v4655_v38, %v3401_v33  ;;  %v1441_v5 = vpop.f32.mrb[27].mxu0  ;;  %3691 = vmatpush3.bf16.msra.mxu1 %v3688_v59 }
 0x6c8   :  { %v1488_v20 = vmul.f32 %v4658_v3, %v1441_v5  ;;  %v3692_v11 = vpack.c.bf16 %v1507_v31, %v1506_v15  ;;  %v1582_v48 = vpop.permute.xlu1 %1581 }
 0x6c9   :  { %v1509_v6 = vadd.f32 %v4731_v8, %v1489_v35  ;;  %vm1656_vm10 = vcmp.eq.s32.totalorder %v4718_v56, %v1582_v48 }
 0x6ca   :  { %v1508_v22 = vadd.f32 %v4731_v8, %v1488_v20  ;;  %v3404_v30 = vpop.f32.mrb[28].mxu0  ;;  %3693 = vmatprep.subr.bf16.mxu1 %v3692_v11 }
 0x6cb   :  { %v1491_v55 = vmul.f32 %v4661_v50, %v3404_v30  ;;  %v1451_v32 = vpop.f32.mrb[29].mxu0  ;;  %3695 = vmatpush3.bf16.msra.mxu1 %v3692_v11 }
 0x6cc   :  { %v1490_v62 = vmul.f32 %v4664_v58, %v1451_v32  ;;  %v3696_v63 = vpack.c.bf16 %v1509_v6, %v1508_v22 }
 0x6cd   :  { %v1511_v38 = vadd.f32 %v4731_v8, %v1491_v55 }
 0x6ce   :  { %v1510_v19 = vadd.f32 %v4731_v8, %v1490_v62  ;;  %v3407_v3 = vpop.f32.mrb[30].mxu0  ;;  %3697 = vmatprep.subr.bf16.mxu1 %v3696_v63 }
 0x6cf   :  { %v1493_v53 = vmul.f32 %v4667_v34, %v3407_v3  ;;  %v1461_v10 = vpop.f32.mrb[31].mxu0  ;;  %3699 = vmatpush3.bf16.msra.mxu1 %v3696_v63 }
 0x6d0   :  { %v1492_v57 = vmul.f32 %v4670_v21, %v1461_v10  ;;  %v3700_v26 = vpack.c.bf16 %v1511_v38, %v1510_v19 }
 0x6d1   :  { %v1513_v50 = vadd.f32 %v4731_v8, %v1493_v53 }
 0x6d2   :  { %v1512_v27 = vadd.f32 %v4731_v8, %v1492_v57  ;;  %v3410_v58 = vpop.f32.mrb[32].mxu0  ;;  %3701 = vmatprep.subr.bf16.mxu1 %v3700_v26 }
 0x6d3   :  { %v1495_v51 = vmul.f32 %v4673_v29, %v3410_v58  ;;  %v1471_v52 = vpop.f32.mrb[33].mxu0  ;;  %3703 = vmatpush3.bf16.msra.mxu1 %v3700_v26  ;;  %v1588_v29 = vpop.permute.xlu1 %1587 }
 0x6d4   :  { %v1494_v46 = vmul.f32 %v4676_v25, %v1471_v52  ;;  %v3704_v34 = vpack.c.bf16 %v1513_v50, %v1512_v27  ;;  %v1591_v25 = vpop.permute.xlu0 %1590  ;;  %vm1658_vm12 = vcmp.eq.s32.totalorder %v4718_v56, %v1588_v29 }
 0x6d5   :  { %v1515_v47 = vadd.f32 %v4731_v8, %v1495_v51  ;;  %vm1659_vm13 = vcmp.eq.s32.totalorder %v4718_v56, %v1591_v25 }
 0x6d6   :  { %v1514_v21 = vadd.f32 %v4731_v8, %v1494_v46  ;;  %3705 = vmatprep.subr.bf16.mxu1 %v3704_v34 }
 0x6d7   :  { %3707 = vmatpush3.bf16.msra.mxu1 %v3704_v34  ;;  %v1594_v8 = vpop.permute.xlu1 %1593 }
 0x6d8   :  { %v3708_v54 = vpack.c.bf16 %v1515_v47, %v1514_v21  ;;  %v1597_v36 = vpop.permute.xlu0 %1596 }
 0x6da   :  { %3709 = vmatprep.subr.bf16.mxu1 %v3708_v54 }
 0x6db   :  { %3711 = vmatpush3.bf16.msra.mxu1 %v3708_v54  ;;  %v1600_v37 = vpop.permute.xlu1 %1599 }
 0x6dc   :  { %3720 = vmatprep.subr.bf16.mxu1 %v5484_v44  ;;  %v1603_v9 = vpop.permute.xlu0 %1602 }
 0x6de   :  { %3444 = vmatmul.mubr.msk.f32.vlgmr.msra.gmra.mrb[48].mxu1 %vm1647_vm14, %v4000_v23  ;;  %vm1660_vm14 = vcmp.eq.s32.totalorder %v4718_v56, %v1594_v8 }
 0x6df   :  { %3446 = vmatprep.mubr.msk.f32.mxu1 %vm1648_vm15, %v4000_v23  ;;  %v1606_v39 = vpop.permute.xlu1 %1605  ;;  %vm1661_vm15 = vcmp.eq.s32.totalorder %v4718_v56, %v1597_v36 }
 0x6e0   :  { %v1609_v18 = vpop.permute.xlu0 %1608 }
 0x6e2   :  { %3447 = vmatmul.mubr.msk.f32.gmra.mrb[50].mxu1 %vm1649_vm0, %v4000_v23  ;;  %vm1662_vm0 = vcmp.eq.s32.totalorder %v4718_v56, %v1600_v37 }
 0x6e3   :  { %3449 = vmatprep.mubr.msk.f32.mxu1 %vm1650_vm1, %v4000_v23  ;;  %v1612_v28 = vpop.permute.xlu1 %1611  ;;  %vm1663_vm1 = vcmp.eq.s32.totalorder %v4718_v56, %v1603_v9 }
 0x6e4   :  { %v1615_v61 = vpop.permute.xlu0 %1614 }
 0x6e6   :  { %3450 = vmatmul.mubr.msk.f32.gmra.mrb[52].mxu1 %vm1651_vm2, %v4000_v23  ;;  %vm1664_vm2 = vcmp.eq.s32.totalorder %v4718_v56, %v1606_v39 }
 0x6e7   :  { %3452 = vmatprep.mubr.msk.f32.mxu1 %vm1652_vm3, %v4000_v23  ;;  %v1618_v43 = vpop.permute.xlu1 %1617  ;;  %vm1665_vm3 = vcmp.eq.s32.totalorder %v4718_v56, %v1609_v18 }
 0x6e8   :  { %v1621_v0 = vpop.permute.xlu0 %1620 }
 0x6ea   :  { %3453 = vmatmul.mubr.msk.f32.gmra.mrb[54].mxu1 %vm1653_vm7, %v4000_v23  ;;  %vm1666_vm7 = vcmp.eq.s32.totalorder %v4718_v56, %v1612_v28 }
 0x6eb   :  { %3455 = vmatprep.mubr.msk.f32.mxu1 %vm1654_vm8, %v4000_v23  ;;  %v1624_v1 = vpop.permute.xlu1 %1623  ;;  %vm1667_vm8 = vcmp.eq.s32.totalorder %v4718_v56, %v1615_v61 }
 0x6ec   :  { %v1627_v12 = vpop.permute.xlu0 %1626 }
 0x6ee   :  { %3456 = vmatmul.mubr.msk.f32.gmra.mrb[56].mxu1 %vm1655_vm9, %v4000_v23  ;;  %vm1668_vm9 = vcmp.eq.s32.totalorder %v4718_v56, %v1618_v43 }
 0x6ef   :  { %3458 = vmatprep.mubr.msk.f32.mxu1 %vm1656_vm10, %v4000_v23  ;;  %v1630_v13 = vpop.permute.xlu1 %1629  ;;  %vm1669_vm10 = vcmp.eq.s32.totalorder %v4718_v56, %v1621_v0 }
 0x6f0   :  { %v1633_v14 = vpop.permute.xlu0 %1632 }
 0x6f2   :  { %3459 = vmatmul.mubr.msk.f32.gmra.mrb[58].mxu1 %vm1657_vm11, %v4000_v23  ;;  %vm1670_vm11 = vcmp.eq.s32.totalorder %v4718_v56, %v1624_v1 }
 0x6f3   :  { %3461 = vmatprep.mubr.msk.f32.mxu1 %vm1658_vm12, %v4000_v23  ;;  %v1636_v16 = vpop.permute.xlu1 %1635  ;;  %vm1671_vm12 = vcmp.eq.s32.totalorder %v4718_v56, %v1627_v12 }
 0x6f4   :  { %v1639_v2 = vpop.permute.xlu0 %1638 }
 0x6f6   :  { %3462 = vmatmul.mubr.msk.f32.gmra.mrb[60].mxu1 %vm1659_vm13, %v4000_v23  ;;  %vm1672_vm13 = vcmp.eq.s32.totalorder %v4718_v56, %v1630_v13 }
 0x6f7   :  { %3464 = vmatprep.mubr.msk.f32.mxu1 %vm1660_vm14, %v4000_v23  ;;  %vm1673_vm14 = vcmp.eq.s32.totalorder %v4718_v56, %v1633_v14  ;;  %v1642_v40 = vpop.permute.xlu1 %1641 }
 0x6f8   :  { %v1645_v24 = vpop.permute.xlu0 %1644 }
 0x6fa   :  { %3465 = vmatmul.mubr.msk.f32.gmra.mrb[62].mxu1 %vm1661_vm15, %v4000_v23  ;;  %vm1674_vm15 = vcmp.eq.s32.totalorder %v4718_v56, %v1636_v16 }
 0x6fb   :  { %3467 = vmatprep.mubr.msk.f32.mxu1 %vm1662_vm0, %v4000_v23  ;;  %vm1675_vm0 = vcmp.eq.s32.totalorder %v4718_v56, %v1639_v2 }
 0x6fe   :  { %3468 = vmatmul.mubr.msk.f32.gmra.mrb[64].mxu1 %vm1663_vm1, %v4000_v23  ;;  %vm1676_vm1 = vcmp.eq.s32.totalorder %v4718_v56, %v1642_v40 }
 0x6ff   :  { %3470 = vmatprep.mubr.msk.f32.mxu1 %vm1664_vm2, %v4000_v23  ;;  %vm1677_vm2 = vcmp.eq.s32.totalorder %v4718_v56, %v1645_v24 }
 0x702   :  { %3471 = vmatmul.mubr.msk.f32.gmra.mrb[66].mxu1 %vm1665_vm3, %v4000_v23 }
 0x703   :  { %3473 = vmatprep.mubr.msk.f32.mxu1 %vm1666_vm7, %v4000_v23 }
 0x706   :  { %3474 = vmatmul.mubr.msk.f32.gmra.mrb[68].mxu1 %vm1667_vm8, %v4000_v23 }
 0x707   :  { %3476 = vmatprep.mubr.msk.f32.mxu1 %vm1668_vm9, %v4000_v23 }
 0x70a   :  { %3477 = vmatmul.mubr.msk.f32.gmra.mrb[70].mxu1 %vm1669_vm10, %v4000_v23 }
 0x70b   :  { %3479 = vmatprep.mubr.msk.f32.mxu1 %vm1670_vm11, %v4000_v23 }
 0x70e   :  { %3480 = vmatmul.mubr.msk.f32.gmra.mrb[72].mxu1 %vm1671_vm12, %v4000_v23 }
 0x70f   :  { %3482 = vmatprep.mubr.msk.f32.mxu1 %vm1672_vm13, %v4000_v23 }
 0x712   :  { %3483 = vmatmul.mubr.msk.f32.gmra.mrb[74].mxu1 %vm1673_vm14, %v4000_v23 }
 0x713   :  { %3485 = vmatprep.mubr.msk.f32.mxu1 %vm1674_vm15, %v4000_v23 }
 0x716   :  { %3486 = vmatmul.mubr.msk.f32.gmra.mrb[76].mxu1 %vm1675_vm0, %v4000_v23 }
 0x717   :  { %3488 = vmatprep.mubr.msk.f32.mxu1 %vm1676_vm1, %v4000_v23 }
 0x71a   :  { %3489 = vmatmul.mubr.msk.f32.gmra.mrb[78].mxu1 %vm1677_vm2, %v4000_v23 }
 0x71b   :  { %3555 = vmatprep.mubr.msk.f32.mxu1 %vm3997_vm5, %v3998_v45 }
 0x7b1   :  { %v4842_v7 = vpop.f32.mrb[48].mxu1 }
 0x7b2   :  { %v4844_v59 = vpop.f32.mrb[49].mxu1  ;;  %v1968_v3 = vmul.f32 %v4842_v7, %v4842_v7 }
 0x7b3   :  { %v1967_v60 = vmul.f32 %v4844_v59, %v4844_v59 }
 0x7b4   :  { %v1986_v58 = vsel %vm270_vm4, %v1968_v3, 0.0 }
 0x7b5   :  { %v4848_v31 = vpop.f32.mrb[50].mxu1  ;;  %v1983_v15 = vsel %vm270_vm4, %v1967_v60, 0.0 }
 0x7b6   :  { %1984 = vadd.xlane.f32.xlu1 %v1983_v15  ;;  %v4851_v33 = vpop.f32.mrb[51].mxu1  ;;  %v1970_v4 = vmul.f32 %v4848_v31, %v4848_v31 }
 0x7b7   :  { %v1969_v42 = vmul.f32 %v4851_v33, %v4851_v33 }
 0x7b8   :  { %v1992_v25 = vsel %vm270_vm4, %v1970_v4, 0.0 }
 0x7b9   :  { %v4853_v56 = vpop.f32.mrb[52].mxu1  ;;  %v1989_v47 = vsel %vm270_vm4, %v1969_v42, 0.0 }
 0x7ba   :  { %v4855_v23 = vpop.f32.mrb[53].mxu1  ;;  %v1972_v37 = vmul.f32 %v4853_v56, %v4853_v56 }
 0x7bb   :  { %v1971_v54 = vmul.f32 %v4855_v23, %v4855_v23 }
 0x7bc   :  { %v1998_v12 = vsel %vm270_vm4, %v1972_v37, 0.0 }
 0x7bd   :  { %v4857_v35 = vpop.f32.mrb[54].mxu1  ;;  %v1995_v18 = vsel %vm270_vm4, %v1971_v54, 0.0 }
 0x7be   :  { %v4859_v45 = vpop.f32.mrb[55].mxu1  ;;  %v1974_v16 = vmul.f32 %v4857_v35, %v4857_v35 }
 0x7bf   :  { %v1973_v43 = vmul.f32 %v4859_v45, %v4859_v45 }
 0x7c1   :  { %v4861_v5 = vpop.f32.mrb[56].mxu1  ;;  %v2001_v24 = vsel %vm270_vm4, %v1973_v43, 0.0 }
 0x7c2   :  { %v4863_v20 = vpop.f32.mrb[57].mxu1 }
 0x7c5   :  { %v4865_v11 = vpop.f32.mrb[58].mxu1 }
 0x7c6   :  { %v4867_v6 = vpop.f32.mrb[59].mxu1 }
 0x7c9   :  { %v4869_v22 = vpop.f32.mrb[60].mxu1 }
 0x7ca   :  { %v4871_v30 = vpop.f32.mrb[61].mxu1 }
 0x7cd   :  { %v4873_v41 = vpop.f32.mrb[62].mxu1 }
 0x7ce   :  { %v4875_v55 = vpop.f32.mrb[63].mxu1 }
 0x7d1   :  { %v4877_v32 = vpop.f32.mrb[64].mxu1 }
 0x7d2   :  { %v2192_v62 = vmul.f32 %v4877_v32, %v4877_v32  ;;  %v4881_v63 = vpop.f32.mrb[65].mxu1 }
 0x7d3   :  { %v2191_v38 = vmul.f32 %v4881_v63, %v4881_v63 }
 0x7d4   :  { %v2210_v19 = vsel %vm270_vm4, %v2192_v62, 0.0  ;;  %v1975_v62 = vmul.f32 %v4863_v20, %v4863_v20 }
 0x7d5   :  { %2211 = vadd.xlane.f32.xlu1 %v2210_v19  ;;  %v4888_v53 = vpop.f32.mrb[66].mxu1  ;;  %v2207_v10 = vsel %vm270_vm4, %v2191_v38, 0.0  ;;  %v2004_v19 = vsel %vm270_vm4, %v1974_v16, 0.0 }
 0x7d6   :  { %2208 = vadd.xlane.f32.xlu0 %v2207_v10  ;;  %v4891_v57 = vpop.f32.mrb[67].mxu1  ;;  %v2194_v50 = vmul.f32 %v4888_v53, %v4888_v53  ;;  %v1976_v10 = vmul.f32 %v4861_v5, %v4861_v5  ;;  %v2007_v42 = vsel %vm270_vm4, %v1975_v62, 0.0 }
 0x7d7   :  { %v2193_v26 = vmul.f32 %v4891_v57, %v4891_v57 }
 0x7d8   :  { %v2216_v21 = vsel %vm270_vm4, %v2194_v50, 0.0  ;;  %v2010_v4 = vsel %vm270_vm4, %v1976_v10, 0.0 }
 0x7d9   :  { %v4899_v27 = vpop.f32.mrb[68].mxu1  ;;  %v2213_v51 = vsel %vm270_vm4, %v2193_v26, 0.0 }
 0x7da   :  { %1987 = vadd.xlane.f32.xlu0 %v1986_v58  ;;  %2214 = vadd.xlane.f32.xlu1 %v2213_v51  ;;  %v4903_v52 = vpop.f32.mrb[69].mxu1  ;;  %v2196_v17 = vmul.f32 %v4899_v27, %v4899_v27  ;;  %v1977_v58 = vmul.f32 %v4867_v6, %v4867_v6 }
 0x7db   :  { %v2195_v46 = vmul.f32 %v4903_v52, %v4903_v52 }
 0x7dc   :  { %v2222_v28 = vsel %vm270_vm4, %v2196_v17, 0.0  ;;  %v1978_v17 = vmul.f32 %v4865_v11, %v4865_v11 }
 0x7dd   :  { %v4909_v34 = vpop.f32.mrb[70].mxu1  ;;  %v2219_v8 = vsel %vm270_vm4, %v2195_v46, 0.0 }
 0x7de   :  { %1990 = vadd.xlane.f32.xlu0 %v1989_v47  ;;  %2217 = vadd.xlane.f32.xlu1 %v2216_v21  ;;  %v4913_v48 = vpop.f32.mrb[71].mxu1  ;;  %v2198_v0 = vmul.f32 %v4909_v34, %v4909_v34  ;;  %v29_v47 = vld [vmem:[%s5479_s3 + $0x60] sm:$0xff]  ;;  %v30_v21 = vld [vmem:[%s5479_s3 + $0x68] sm:$0xff] }
 0x7df   :  { %v2197_v9 = vmul.f32 %v4913_v48, %v4913_v48  ;;  %v3712_v54 = vpack.c.bf16 %v30_v21, %v29_v47 }
 0x7e0   :  { %v2228_v60 = vsel %vm270_vm4, %v2198_v0, 0.0  ;;  %v1980_v0 = vmul.f32 %v4869_v22, %v4869_v22 }
 0x7e1   :  { %v4919_v29 = vpop.f32.mrb[72].mxu1  ;;  %v2225_v13 = vsel %vm270_vm4, %v2197_v9, 0.0  ;;  %3713 = vmatprep.subr.bf16.mxu0 %v3712_v54  ;;  %v1979_v9 = vmul.f32 %v4871_v30, %v4871_v30 }
 0x7e2   :  { %1993 = vadd.xlane.f32.xlu0 %v1992_v25  ;;  %2220 = vadd.xlane.f32.xlu1 %v2219_v8  ;;  %v4923_v36 = vpop.f32.mrb[73].mxu1  ;;  %v2200_v38 = vmul.f32 %v4919_v29, %v4919_v29  ;;  %v2013_v8 = vsel %vm270_vm4, %v1977_v58, 0.0  ;;  %v39_v58 = vld [vmem:[%s5479_s3 + $0x86] sm:$0x1] }
 0x7e3   :  { %v2199_v2 = vmul.f32 %v4923_v36, %v4923_v36  ;;  %3715 = vmatpush3.bf16.msra.mxu0 %v3712_v54 }
 0x7e4   :  { %v2234_v50 = vsel %vm270_vm4, %v2200_v38, 0.0  ;;  %v31_v38 = vld [vmem:[%s5479_s3 + $0x70] sm:$0xff] }
 0x7e5   :  { %v4929_v39 = vpop.f32.mrb[74].mxu1  ;;  %v2231_v3 = vsel %vm270_vm4, %v2199_v2, 0.0  ;;  %v1981_v2 = vmul.f32 %v4875_v55, %v4875_v55 }
 0x7e6   :  { %1996 = vadd.xlane.f32.xlu0 %v1995_v18  ;;  %2223 = vadd.xlane.f32.xlu1 %v2222_v28  ;;  %v4933_v61 = vpop.f32.mrb[75].mxu1  ;;  %v2202_v51 = vmul.f32 %v4929_v39, %v4929_v39  ;;  %v2016_v28 = vsel %vm270_vm4, %v1978_v17, 0.0 }
 0x7e7   :  { %v2201_v26 = vmul.f32 %v4933_v61, %v4933_v61  ;;  %v2025_v10 = vsel %vm270_vm4, %v1981_v2, 0.0 }
 0x7e8   :  { %v2240_v37 = vsel %vm270_vm4, %v2202_v51, 0.0 }
 0x7e9   :  { %v4939_v1 = vpop.f32.mrb[76].mxu1  ;;  %v2237_v46 = vsel %vm270_vm4, %v2201_v26, 0.0 }
 0x7ea   :  { %1999 = vadd.xlane.f32.xlu0 %v1998_v12  ;;  %2226 = vadd.xlane.f32.xlu1 %v2225_v13  ;;  %v4943_v14 = vpop.f32.mrb[77].mxu1  ;;  %v2204_v18 = vmul.f32 %v4939_v1, %v4939_v1  ;;  %v2019_v13 = vsel %vm270_vm4, %v1979_v9, 0.0 }
 0x7eb   :  { %v2203_v25 = vmul.f32 %v4943_v14, %v4943_v14 }
 0x7ec   :  { %v2246_v16 = vsel %vm270_vm4, %v2204_v18, 0.0 }
 0x7ed   :  { %v4949_v40 = vpop.f32.mrb[78].mxu1  ;;  %v2243_v43 = vsel %vm270_vm4, %v2203_v25, 0.0 }
 0x7ee   :  { %2002 = vadd.xlane.f32.xlu0 %v2001_v24  ;;  %2229 = vadd.xlane.f32.xlu1 %v2228_v60  ;;  %v4953_v15 = vpop.f32.mrb[79].mxu1  ;;  %v2206_v24 = vmul.f32 %v4949_v40, %v4949_v40  ;;  %v2022_v60 = vsel %vm270_vm4, %v1980_v0, 0.0 }
 0x7ef   :  { %v2205_v12 = vmul.f32 %v4953_v15, %v4953_v15 }
 0x7f0   :  { %v2252_v26 = vsel %vm270_vm4, %v2206_v24, 0.0 }
 0x7f1   :  { %v2249_v62 = vsel %vm270_vm4, %v2205_v12, 0.0 }
 0x7f2   :  { %2005 = vadd.xlane.f32.xlu0 %v2004_v19  ;;  %2232 = vadd.xlane.f32.xlu1 %v2231_v3  ;;  %v32_v19 = vld [vmem:[%s5479_s3 + $0x78] sm:$0xff]  ;;  %v1982_v3 = vmul.f32 %v4873_v41, %v4873_v41 }
 0x7f6   :  { %2008 = vadd.xlane.f32.xlu0 %v2007_v42  ;;  %2235 = vadd.xlane.f32.xlu1 %v2234_v50  ;;  %v3716_v42 = vpack.c.bf16 %v32_v19, %v31_v38  ;;  %v2028_v50 = vsel %vm270_vm4, %v1982_v3, 0.0 }
 0x7f8   :  { %3717 = vmatprep.subr.bf16.mxu0 %v3716_v42 }
 0x7f9   :  { %3719 = vmatpush3.bf16.msra.mxu0 %v3716_v42 }
 0x7fa   :  { %2011 = vadd.xlane.f32.xlu0 %v2010_v4  ;;  %2238 = vadd.xlane.f32.xlu1 %v2237_v46 }
 0x7fe   :  { %2014 = vadd.xlane.f32.xlu0 %v2013_v8  ;;  %2241 = vadd.xlane.f32.xlu1 %v2240_v37 }
 0x802   :  { %2017 = vadd.xlane.f32.xlu0 %v2016_v28  ;;  %2244 = vadd.xlane.f32.xlu1 %v2243_v43 }
 0x806   :  { %2020 = vadd.xlane.f32.xlu0 %v2019_v13  ;;  %2247 = vadd.xlane.f32.xlu1 %v2246_v16 }
 0x80a   :  { %2023 = vadd.xlane.f32.xlu0 %v2022_v60  ;;  %2250 = vadd.xlane.f32.xlu1 %v2249_v62 }
 0x80e   :  { %2026 = vadd.xlane.f32.xlu0 %v2025_v10  ;;  %2253 = vadd.xlane.f32.xlu1 %v2252_v26 }
 0x812   :  { %2029 = vadd.xlane.f32.xlu0 %v2028_v50 }
 0x828   :  { %2646 = vperm.xlu0 %3758, %v39_v58  }
 0x843   :  { %v1985_v51 = vpop.xlane.xlu1 %1984 }
 0x844   :  { %3856 = vrsqrt.f32 %v1985_v51  ;;  %vm2033_vm5 = vcmp.eq.f32.partialorder %v1985_v51, inf  ;;  %v2036_v21 = vand.u32 2147483648, %v1985_v51  ;;  %vm2035_vm3 = vcmp.eq.f32.partialorder %v1985_v51, 0.0 }
 0x84e   :  { %v3857_v4 = vpop.eup %3856 }
 0x84f   :  { %v2032_v46 = vmul.f32 %v3857_v4, %v1985_v51 }
 0x851   :  { %v2034_v47 = vsel %vm2033_vm5, %v1985_v51, %v2032_v46 }
 0x852   :  { %v2037_v54 = vsel %vm2035_vm3, %v2036_v21, %v2034_v47 }
 0x853   :  { %v2143_v17 = vmax.f32 %v2037_v54, 1e-12 }
 0x855   :  { %3858 = vrcp.f32 %v2143_v17 }
 0x85f   :  { %v3859_v18 = vpop.eup %3858 }
 0x860   :  { %v5024_v16 = vmul.f32 %v3859_v18, %v4844_v59 }
 0x862   :  { %v2212_v25 = vpop.xlane.xlu1 %2211 }
 0x863   :  { %3860 = vrsqrt.f32 %v2212_v25  ;;  %v2209_v8 = vpop.xlane.xlu0 %2208  ;;  %vm2264_vm7 = vcmp.eq.f32.partialorder %v2212_v25, inf  ;;  %vm2266_vm8 = vcmp.eq.f32.partialorder %v2212_v25, 0.0  ;;  %v2267_v2 = vand.u32 2147483648, %v2212_v25 }
 0x864   :  { %3862 = vrsqrt.f32 %v2209_v8  ;;  %vm2257_vm9 = vcmp.eq.f32.partialorder %v2209_v8, inf  ;;  %vm2259_vm10 = vcmp.eq.f32.partialorder %v2209_v8, 0.0  ;;  %v2260_v19 = vand.u32 2147483648, %v2209_v8 }
 0x867   :  { %v2215_v37 = vpop.xlane.xlu1 %2214  ;;  %v1988_v9 = vpop.xlane.xlu0 %1987 }
 0x868   :  { %3864 = vrsqrt.f32 %v2215_v37  ;;  %vm2271_vm11 = vcmp.eq.f32.partialorder %v2215_v37, inf  ;;  %vm2273_vm12 = vcmp.eq.f32.partialorder %v2215_v37, 0.0  ;;  %v2274_v3 = vand.u32 2147483648, %v2215_v37 }
 0x869   :  { %3866 = vrsqrt.f32 %v1988_v9  ;;  %vm2040_vm13 = vcmp.eq.f32.partialorder %v1988_v9, inf  ;;  %vm2042_vm14 = vcmp.eq.f32.partialorder %v1988_v9, 0.0  ;;  %v2043_v26 = vand.u32 2147483648, %v1988_v9 }
 0x86b   :  { %v5017_v28 = vpop.xlane.xlu1 %2217  ;;  %v5019_v43 = vpop.xlane.xlu0 %1990 }
 0x86c   :  { %3868 = vrsqrt.f32 %v5017_v28  ;;  %vm2278_vm15 = vcmp.eq.f32.partialorder %v5017_v28, inf  ;;  %vm2280_vm0 = vcmp.eq.f32.partialorder %v5017_v28, 0.0  ;;  %v2281_v51 = vand.u32 2147483648, %v5017_v28 }
 0x86d   :  { %v3861_v0 = vpop.eup %3860  ;;  %3870 = vrsqrt.f32 %v5019_v43  ;;  %vm2047_vm1 = vcmp.eq.f32.partialorder %v5019_v43, inf  ;;  %vm2049_vm2 = vcmp.eq.f32.partialorder %v5019_v43, 0.0  ;;  %v2050_v21 = vand.u32 2147483648, %v5019_v43 }
 0x86e   :  { %v3863_v12 = vpop.eup %3862  ;;  %v2263_v13 = vmul.f32 %v3861_v0, %v2212_v25 }
 0x86f   :  { %v2256_v24 = vmul.f32 %v3863_v12, %v2209_v8  ;;  %v5026_v60 = vpop.xlane.xlu1 %2220  ;;  %v5028_v62 = vpop.xlane.xlu0 %1993 }
 0x870   :  { %v2265_v38 = vsel %vm2264_vm7, %v2212_v25, %v2263_v13  ;;  %3872 = vrsqrt.f32 %v5026_v60  ;;  %vm2285_vm5 = vcmp.eq.f32.partialorder %v5026_v60, inf  ;;  %vm2287_vm3 = vcmp.eq.f32.partialorder %v5026_v60, 0.0 }
 0x871   :  { %3874 = vrsqrt.f32 %v5028_v62  ;;  %v2258_v10 = vsel %vm2257_vm9, %v2209_v8, %v2256_v24  ;;  %v2268_v50 = vsel %vm2266_vm8, %v2267_v2, %v2265_v38  ;;  %v2288_v24 = vand.u32 2147483648, %v5026_v60 }
 0x872   :  { %v3865_v59 = vpop.eup %3864  ;;  %v2261_v54 = vsel %vm2259_vm10, %v2260_v19, %v2258_v10  ;;  %v2368_v18 = vmax.f32 %v2268_v50, 1e-12  ;;  %vm2054_vm7 = vcmp.eq.f32.partialorder %v5028_v62, inf  ;;  %vm2056_vm8 = vcmp.eq.f32.partialorder %v5028_v62, 0.0 }
 0x873   :  { %v3867_v42 = vpop.eup %3866  ;;  %v2270_v58 = vmul.f32 %v3865_v59, %v2215_v37  ;;  %v5036_v4 = vpop.xlane.xlu1 %2223  ;;  %v2367_v59 = vmax.f32 %v2261_v54, 1e-12  ;;  %v2057_v10 = vand.u32 2147483648, %v5028_v62 }
 0x874   :  { %v5038_v46 = vpop.xlane.xlu0 %1996  ;;  %v2039_v47 = vmul.f32 %v3867_v42, %v1988_v9  ;;  %3876 = vrsqrt.f32 %v5036_v4  ;;  %vm2292_vm9 = vcmp.eq.f32.partialorder %v5036_v4, inf  ;;  %vm2294_vm10 = vcmp.eq.f32.partialorder %v5036_v4, 0.0 }
 0x875   :  { %v2272_v17 = vsel %vm2271_vm11, %v2215_v37, %v2270_v58  ;;  %3878 = vrsqrt.f32 %v5038_v46  ;;  %vm2061_vm11 = vcmp.eq.f32.partialorder %v5038_v46, inf }
 0x876   :  { %v3869_v25 = vpop.eup %3868  ;;  %v2275_v0 = vsel %vm2273_vm12, %v2274_v3, %v2272_v17  ;;  %v2041_v12 = vsel %vm2040_vm13, %v1988_v9, %v2039_v47  ;;  %vm2063_vm12 = vcmp.eq.f32.partialorder %v5038_v46, 0.0 }
 0x877   :  { %v3871_v13 = vpop.eup %3870  ;;  %v2044_v2 = vsel %vm2042_vm14, %v2043_v26, %v2041_v12  ;;  %v2277_v8 = vmul.f32 %v3869_v25, %v5017_v28  ;;  %v5054_v38 = vpop.xlane.xlu1 %2226  ;;  %v2369_v3 = vmax.f32 %v2275_v0, 1e-12 }
 0x878   :  { %v5056_v19 = vpop.xlane.xlu0 %1999  ;;  %v2046_v37 = vmul.f32 %v3871_v13, %v5019_v43  ;;  %3880 = vrsqrt.f32 %v5054_v38  ;;  %v2144_v42 = vmax.f32 %v2044_v2, 1e-12  ;;  %v2064_v2 = vand.u32 2147483648, %v5038_v46 }
 0x879   :  { %v2279_v9 = vsel %vm2278_vm15, %v5017_v28, %v2277_v8  ;;  %3882 = vrcp.f32 %v2368_v18  ;;  %vm2299_vm13 = vcmp.eq.f32.partialorder %v5054_v38, inf  ;;  %vm2301_vm14 = vcmp.eq.f32.partialorder %v5054_v38, 0.0 }
 0x87a   :  { %v3873_v26 = vpop.eup %3872  ;;  %v2282_v50 = vsel %vm2280_vm0, %v2281_v51, %v2279_v9  ;;  %v2048_v58 = vsel %vm2047_vm1, %v5019_v43, %v2046_v37  ;;  %3884 = vrsqrt.f32 %v5056_v19  ;;  %v2295_v51 = vand.u32 2147483648, %v5036_v4 }
 0x87b   :  { %v3875_v47 = vpop.eup %3874  ;;  %v2051_v54 = vsel %vm2049_vm2, %v2050_v21, %v2048_v58  ;;  %v2284_v17 = vmul.f32 %v3873_v26, %v5026_v60  ;;  %v5076_v25 = vpop.xlane.xlu1 %2229  ;;  %3886 = vrcp.f32 %v2367_v59  ;;  %v2370_v43 = vmax.f32 %v2282_v50, 1e-12 }
 0x87c   :  { %v5078_v18 = vpop.xlane.xlu0 %2002  ;;  %v2053_v28 = vmul.f32 %v3875_v47, %v5028_v62  ;;  %3888 = vrcp.f32 %v2369_v3  ;;  %v2145_v0 = vmax.f32 %v2051_v54, 1e-12  ;;  %vm2068_vm15 = vcmp.eq.f32.partialorder %v5056_v19, inf }
 0x87d   :  { %v2286_v21 = vsel %vm2285_vm5, %v5026_v60, %v2284_v17  ;;  %3890 = vrcp.f32 %v2144_v42  ;;  %vm2070_vm0 = vcmp.eq.f32.partialorder %v5056_v19, 0.0  ;;  %vm2306_vm1 = vcmp.eq.f32.partialorder %v5076_v25, inf }
 0x87e   :  { %v2289_v12 = vsel %vm2287_vm3, %v2288_v24, %v2286_v21  ;;  %v2055_v13 = vsel %vm2054_vm7, %v5028_v62, %v2053_v28  ;;  %3892 = vrsqrt.f32 %v5076_v25  ;;  %v3877_v37 = vpop.eup %3876  ;;  %v2302_v24 = vand.u32 2147483648, %v5054_v38 }
 0x87f   :  { %v5096_v8 = vpop.xlane.xlu1 %2232  ;;  %v2058_v60 = vsel %vm2056_vm8, %v2057_v10, %v2055_v13  ;;  %3894 = vrsqrt.f32 %v5078_v18  ;;  %v3879_v3 = vpop.eup %3878  ;;  %v2371_v9 = vmax.f32 %v2289_v12, 1e-12  ;;  %v2291_v26 = vmul.f32 %v3877_v37, %v5036_v4 }
 0x880   :  { %v5098_v59 = vpop.xlane.xlu0 %2005  ;;  %3896 = vrcp.f32 %v2370_v43  ;;  %v2060_v50 = vmul.f32 %v3879_v3, %v5038_v46  ;;  %v2071_v62 = vand.u32 2147483648, %v5056_v19  ;;  %v2146_v10 = vmax.f32 %v2058_v60, 1e-12 }
 0x881   :  { %3898 = vrcp.f32 %v2145_v0  ;;  %v2293_v58 = vsel %vm2292_vm9, %v5036_v4, %v2291_v26  ;;  %vm2308_vm2 = vcmp.eq.f32.partialorder %v5076_v25, 0.0  ;;  %v2309_v0 = vand.u32 2147483648, %v5076_v25 }
 0x882   :  { %v3881_v42 = vpop.eup %3880  ;;  %3900 = vrsqrt.f32 %v5096_v8  ;;  %v2296_v43 = vsel %vm2294_vm10, %v2295_v51, %v2293_v58  ;;  %v2062_v21 = vsel %vm2061_vm11, %v5038_v46, %v2060_v50  ;;  %vm2075_vm5 = vcmp.eq.f32.partialorder %v5078_v18, inf }
 0x883   :  { %v2298_v47 = vmul.f32 %v3881_v42, %v5054_v38  ;;  %v5116_v54 = vpop.xlane.xlu1 %2235  ;;  %v5120_v28 = vpop.eup %3882  ;;  %3902 = vrsqrt.f32 %v5098_v59  ;;  %v2372_v13 = vmax.f32 %v2296_v43, 1e-12  ;;  %v2065_v37 = vsel %vm2063_vm12, %v2064_v2, %v2062_v21 }
 0x884   :  { %v5118_v17 = vpop.xlane.xlu0 %2008  ;;  %v3885_v12 = vpop.eup %3884  ;;  %3904 = vrcp.f32 %v2371_v9  ;;  %vm2077_vm3 = vcmp.eq.f32.partialorder %v5078_v18, 0.0  ;;  %v2078_v46 = vand.u32 2147483648, %v5078_v18  ;;  %vm2313_vm7 = vcmp.eq.f32.partialorder %v5096_v8, inf }
 0x885   :  { %v2300_v4 = vsel %vm2299_vm13, %v5054_v38, %v2298_v47  ;;  %v3887_v51 = vpop.eup %3886  ;;  %v2067_v3 = vmul.f32 %v3885_v12, %v5056_v19  ;;  %3906 = vrsqrt.f32 %v5116_v54  ;;  %vm2315_vm8 = vcmp.eq.f32.partialorder %v5096_v8, 0.0 }
 0x886   :  { %v2303_v60 = vsel %vm2301_vm14, %v2302_v24, %v2300_v4  ;;  %v5140_v26 = vpop.eup %3888  ;;  %3908 = vrcp.f32 %v2146_v10  ;;  %v2147_v24 = vmax.f32 %v2065_v37, 1e-12  ;;  %v2316_v50 = vand.u32 2147483648, %v5096_v8 }
 0x887   :  { %v5145_v2 = vpop.xlane.xlu1 %2238  ;;  %v3891_v38 = vpop.eup %3890  ;;  %v2069_v42 = vsel %vm2068_vm15, %v5056_v19, %v2067_v3  ;;  %vm2082_vm9 = vcmp.eq.f32.partialorder %v5098_v59, inf  ;;  %3910 = vrcp.f32 %v2372_v13  ;;  %v2373_v58 = vmax.f32 %v2303_v60, 1e-12 }
 0x888   :  { %v5147_v9 = vpop.xlane.xlu0 %2011  ;;  %v3893_v10 = vpop.eup %3892  ;;  %vm2084_vm10 = vcmp.eq.f32.partialorder %v5098_v59, 0.0  ;;  %v2085_v47 = vand.u32 2147483648, %v5098_v59  ;;  %v2072_v21 = vsel %vm2070_vm0, %v2071_v62, %v2069_v42  ;;  %3912 = vrsqrt.f32 %v5118_v17 }
 0x889   :  { %v3895_v43 = vpop.eup %3894  ;;  %v2305_v12 = vmul.f32 %v3893_v10, %v5076_v25  ;;  %v2384_v37 = vmul.f32 %v3887_v51, %v4881_v63  ;;  %vm2320_vm11 = vcmp.eq.f32.partialorder %v5116_v54, inf  ;;  %vm2322_vm12 = vcmp.eq.f32.partialorder %v5116_v54, 0.0 }
 0x88a   :  { %v5162_v4 = vpop.eup %3896  ;;  %v2074_v3 = vmul.f32 %v3895_v43, %v5078_v18  ;;  %3914 = vrsqrt.f32 %v5145_v2  ;;  %v2323_v51 = vand.u32 2147483648, %v5116_v54  ;;  %v2148_v10 = vmax.f32 %v2072_v21, 1e-12 }
 0x88b   :  { %v5168_v13 = vpop.xlane.xlu1 %2241  ;;  %v3899_v62 = vpop.eup %3898  ;;  %3916 = vrcp.f32 %v2147_v24  ;;  %v2307_v63 = vsel %vm2306_vm1, %v5076_v25, %v2305_v12  ;;  %v2415_v60 = vmul.f32 %v2384_v37, %v5024_v16  ;;  %vm2089_vm13 = vcmp.eq.f32.partialorder %v5118_v17, inf }
 0x88c   :  { %v5170_v19 = vpop.xlane.xlu0 %2014  ;;  %v3901_v42 = vpop.eup %3900  ;;  %v2310_v43 = vsel %vm2308_vm2, %v2309_v0, %v2307_v63  ;;  %v2076_v44 = vsel %vm2075_vm5, %v5078_v18, %v2074_v3  ;;  %3918 = vrsqrt.f32 %v5147_v9  ;;  %vm2091_vm14 = vcmp.eq.f32.partialorder %v5118_v17, 0.0 }
 0x88d   :  { %v3903_v24 = vpop.eup %3902  ;;  %3920 = vrcp.f32 %v2373_v58  ;;  %v2079_v12 = vsel %vm2077_vm3, %v2078_v46, %v2076_v44  ;;  %v2312_v49 = vmul.f32 %v3901_v42, %v5096_v8  ;;  %3499 = vmatprep.mubr.msk.f32.mxu0 %vm270_vm4, %v2415_v60  ;;  %v2374_v25 = vmax.f32 %v2310_v43, 1e-12 }
 0x88e   :  { %v5188_v16 = vpop.eup %3904  ;;  %v2081_v0 = vmul.f32 %v3903_v24, %v5098_v59  ;;  %v2092_v21 = vand.u32 2147483648, %v5118_v17  ;;  %v2162_v58 = vmul.f32 %v3891_v38, %v4842_v7  ;;  %v2149_v18 = vmax.f32 %v2079_v12, 1e-12 }
 0x88f   :  { %v3907_v37 = vpop.eup %3906  ;;  %v2314_v44 = vsel %vm2313_vm7, %v5096_v8, %v2312_v49  ;;  %vm2327_vm15 = vcmp.eq.f32.partialorder %v5145_v2, inf  ;;  %v2386_v46 = vmul.f32 %v5120_v28, %v4877_v32  ;;  %v5200_v3 = vpop.xlane.xlu1 %2244  ;;  %3922 = vrcp.f32 %v2148_v10 }
 0x890   :  { %v3909_v63 = vpop.eup %3908  ;;  %v2317_v60 = vsel %vm2315_vm8, %v2316_v50, %v2314_v44  ;;  %v2083_v7 = vsel %vm2082_vm9, %v5098_v59, %v2081_v0  ;;  %v2319_v38 = vmul.f32 %v3907_v37, %v5116_v54  ;;  %v5208_v42 = vpop.xlane.xlu0 %2017  ;;  %3924 = vrsqrt.f32 %v5168_v13 }
 0x891   :  { %v2375_v49 = vmax.f32 %v2317_v60, 1e-12  ;;  %v2086_v43 = vsel %vm2084_vm10, %v2085_v47, %v2083_v7  ;;  %v2416_v32 = vmul.f32 %v2386_v46, %v2162_v58  ;;  %v5213_v28 = vpop.eup %3910  ;;  %3926 = vrcp.f32 %v2374_v25 }
 0x892   :  { %v2150_v8 = vmax.f32 %v2086_v43, 1e-12  ;;  %v2321_v50 = vsel %vm2320_vm11, %v5116_v54, %v2319_v38  ;;  %vm2329_vm0 = vcmp.eq.f32.partialorder %v5145_v2, 0.0  ;;  %v3913_v10 = vpop.eup %3912  ;;  %3928 = vrcp.f32 %v2149_v18 }
 0x893   :  { %v2324_v24 = vsel %vm2322_vm12, %v2323_v51, %v2321_v50  ;;  %v2330_v59 = vand.u32 2147483648, %v5145_v2  ;;  %vm2096_vm1 = vcmp.eq.f32.partialorder %v5147_v9, inf  ;;  %3500 = vmatmul.mubr.msk.f32.vlgmr.msra.gmra.mrb[34].mxu0 %vm270_vm4, %v2416_v32  ;;  %3930 = vrcp.f32 %v2375_v49  ;;  %v5232_v37 = vpop.xlane.xlu1 %2247 }
 0x894   :  { %v3915_v47 = vpop.eup %3914  ;;  %v2088_v12 = vmul.f32 %v3913_v10, %v5118_v17  ;;  %vm2098_vm2 = vcmp.eq.f32.partialorder %v5147_v9, 0.0  ;;  %v2099_v25 = vand.u32 2147483648, %v5147_v9  ;;  %3932 = vrsqrt.f32 %v5170_v19  ;;  %v5238_v60 = vpop.xlane.xlu0 %2020 }
 0x895   :  { %v3917_v0 = vpop.eup %3916  ;;  %v2326_v58 = vmul.f32 %v3915_v47, %v5145_v2  ;;  %v2164_v54 = vmul.f32 %v3899_v62, %v4851_v33  ;;  %v2388_v51 = vmul.f32 %v5140_v26, %v4891_v57  ;;  %3934 = vrcp.f32 %v2150_v8 }
 0x896   :  { %v3919_v18 = vpop.eup %3918  ;;  %v2376_v44 = vmax.f32 %v2324_v24, 1e-12  ;;  %v2090_v46 = vsel %vm2089_vm13, %v5118_v17, %v2088_v12  ;;  %vm2334_vm5 = vcmp.eq.f32.partialorder %v5168_v13, inf  ;;  %vm2336_vm3 = vcmp.eq.f32.partialorder %v5168_v13, 0.0 }
 0x897   :  { %v5240_v7 = vpop.eup %3920  ;;  %v2093_v33 = vsel %vm2091_vm14, %v2092_v21, %v2090_v46  ;;  %v2328_v57 = vsel %vm2327_vm15, %v5145_v2, %v2326_v58  ;;  %v2095_v26 = vmul.f32 %v3919_v18, %v5147_v9  ;;  %v2417_v62 = vmul.f32 %v2388_v51, %v2164_v54 }
 0x898   :  { %v2151_v38 = vmax.f32 %v2093_v33, 1e-12  ;;  %v2331_v49 = vsel %vm2329_vm0, %v2330_v59, %v2328_v57  ;;  %3936 = vrsqrt.f32 %v5200_v3  ;;  %v2337_v21 = vand.u32 2147483648, %v5168_v13  ;;  %v5266_v59 = vpop.xlane.xlu1 %2250 }
 0x899   :  { %v2377_v43 = vmax.f32 %v2331_v49, 1e-12  ;;  %v2097_v17 = vsel %vm2096_vm1, %v5147_v9, %v2095_v26  ;;  %3502 = vmatprep.mubr.msk.f32.mxu0 %vm270_vm4, %v2417_v62  ;;  %3938 = vrsqrt.f32 %v5208_v42  ;;  %v3923_v32 = vpop.eup %3922  ;;  %vm2103_vm7 = vcmp.eq.f32.partialorder %v5170_v19, inf }
 0x89a   :  { %3940 = vrcp.f32 %v2376_v44  ;;  %v2100_v2 = vsel %vm2098_vm2, %v2099_v25, %v2097_v17  ;;  %vm2105_vm8 = vcmp.eq.f32.partialorder %v5170_v19, 0.0  ;;  %v3925_v8 = vpop.eup %3924  ;;  %v2106_v50 = vand.u32 2147483648, %v5170_v19  ;;  %v5273_v25 = vpop.xlane.xlu0 %2023 }
 0x89b   :  { %3942 = vrcp.f32 %v2151_v38  ;;  %v2166_v10 = vmul.f32 %v3909_v63, %v4848_v31  ;;  %v2390_v24 = vmul.f32 %v5162_v4, %v4888_v53  ;;  %v5268_v47 = vpop.eup %3926  ;;  %v2152_v12 = vmax.f32 %v2100_v2, 1e-12 }
 0x89c   :  { %v2333_v9 = vmul.f32 %v3925_v8, %v5168_v13  ;;  %vm2341_vm9 = vcmp.eq.f32.partialorder %v5200_v3, inf  ;;  %3944 = vrsqrt.f32 %v5232_v37  ;;  %v5275_v58 = vpop.eup %3928  ;;  %vm2343_vm10 = vcmp.eq.f32.partialorder %v5200_v3, 0.0 }
 0x89d   :  { %3946 = vrcp.f32 %v2377_v43  ;;  %v2344_v31 = vand.u32 2147483648, %v5200_v3  ;;  %v2418_v53 = vmul.f32 %v2390_v24, %v2166_v10  ;;  %v5279_v4 = vpop.eup %3930  ;;  %vm2110_vm11 = vcmp.eq.f32.partialorder %v5208_v42, inf }
 0x89e   :  { %v2335_v63 = vsel %vm2334_vm5, %v5168_v13, %v2333_v9  ;;  %vm2112_vm12 = vcmp.eq.f32.partialorder %v5208_v42, 0.0  ;;  %3948 = vrsqrt.f32 %v5238_v60  ;;  %v3933_v54 = vpop.eup %3932  ;;  %v2168_v18 = vmul.f32 %v3917_v0, %v4855_v23  ;;  %v5301_v23 = vpop.xlane.xlu1 %2253 }
 0x89f   :  { %v2338_v51 = vsel %vm2336_vm3, %v2337_v21, %v2335_v63  ;;  %3503 = vmatmul.mubr.msk.f32.gmra.mrb[36].mxu0 %vm270_vm4, %v2418_v53  ;;  %v2392_v44 = vmul.f32 %v5188_v16, %v4903_v52  ;;  %3950 = vrsqrt.f32 %v5266_v59  ;;  %v5294_v46 = vpop.eup %3934  ;;  %v2102_v33 = vmul.f32 %v3933_v54, %v5170_v19  ;;  %v5309_v38 = vpop.xlane.xlu0 %2026 }
 0x8a0   :  { %3952 = vrcp.f32 %v2152_v12  ;;  %v2113_v57 = vand.u32 2147483648, %v5208_v42  ;;  %vm2348_vm13 = vcmp.eq.f32.partialorder %v5232_v37, inf  ;;  %v2378_v13 = vmax.f32 %v2338_v51, 1e-12 }
 0x8a1   :  { %vm2350_vm14 = vcmp.eq.f32.partialorder %v5232_v37, 0.0  ;;  %v2419_v26 = vmul.f32 %v2392_v44, %v2168_v18  ;;  %3954 = vrsqrt.f32 %v5273_v25  ;;  %v2104_v16 = vsel %vm2103_vm7, %v5170_v19, %v2102_v33 }
 0x8a2   :  { %v3937_v52 = vpop.eup %3936  ;;  %v2351_v0 = vand.u32 2147483648, %v5232_v37  ;;  %vm2117_vm15 = vcmp.eq.f32.partialorder %v5238_v60, inf  ;;  %v2120_v62 = vand.u32 2147483648, %v5238_v60  ;;  %v2107_v43 = vsel %vm2105_vm8, %v2106_v50, %v2104_v16 }
 0x8a3   :  { %v3939_v49 = vpop.eup %3938  ;;  %v2340_v17 = vmul.f32 %v3937_v52, %v5200_v3  ;;  %vm2119_vm0 = vcmp.eq.f32.partialorder %v5238_v60, 0.0  ;;  %3505 = vmatprep.mubr.msk.f32.mxu0 %vm270_vm4, %v2419_v26  ;;  %v2170_v21 = vmul.f32 %v3923_v32, %v4853_v56  ;;  %v2394_v2 = vmul.f32 %v5213_v28, %v4899_v27  ;;  %v5346_v18 = vpop.xlane.xlu0 %2029 }
 0x8a4   :  { %v5319_v8 = vpop.eup %3940  ;;  %v2153_v10 = vmax.f32 %v2107_v43, 1e-12  ;;  %v2109_v24 = vmul.f32 %v3939_v49, %v5208_v42  ;;  %vm2355_vm1 = vcmp.eq.f32.partialorder %v5266_v59, inf  ;;  %3956 = vrsqrt.f32 %v5301_v23 }
 0x8a5   :  { %v3943_v19 = vpop.eup %3942  ;;  %3958 = vrcp.f32 %v2378_v13  ;;  %v2342_v50 = vsel %vm2341_vm9, %v5200_v3, %v2340_v17  ;;  %vm2357_vm2 = vcmp.eq.f32.partialorder %v5266_v59, 0.0  ;;  %v2420_v56 = vmul.f32 %v2394_v2, %v2170_v21 }
 0x8a6   :  { %v3945_v32 = vpop.eup %3944  ;;  %3960 = vrcp.f32 %v2153_v10  ;;  %v2345_v27 = vsel %vm2343_vm10, %v2344_v31, %v2342_v50  ;;  %v2111_v28 = vsel %vm2110_vm11, %v5208_v42, %v2109_v24  ;;  %v2358_v12 = vand.u32 2147483648, %v5266_v59 }
 0x8a7   :  { %v5334_v9 = vpop.eup %3946  ;;  %v2114_v53 = vsel %vm2112_vm12, %v2113_v57, %v2111_v28  ;;  %v2347_v63 = vmul.f32 %v3945_v32, %v5232_v37  ;;  %vm2124_vm5 = vcmp.eq.f32.partialorder %v5273_v25, inf  ;;  %3506 = vmatmul.mubr.msk.f32.gmra.mrb[38].mxu0 %vm270_vm4, %v2420_v56  ;;  %3962 = vrsqrt.f32 %v5309_v38 }
 0x8a8   :  { %v3949_v3 = vpop.eup %3948  ;;  %v2154_v31 = vmax.f32 %v2114_v53, 1e-12  ;;  %vm2126_vm3 = vcmp.eq.f32.partialorder %v5273_v25, 0.0  ;;  %v2127_v54 = vand.u32 2147483648, %v5273_v25  ;;  %v2172_v51 = vmul.f32 %v5275_v58, %v4859_v45 }
 0x8a9   :  { %v3951_v42 = vpop.eup %3950  ;;  %v2379_v44 = vmax.f32 %v2345_v27, 1e-12  ;;  %v2349_v33 = vsel %vm2348_vm13, %v5232_v37, %v2347_v63  ;;  %v2116_v57 = vmul.f32 %v3949_v3, %v5238_v60  ;;  %v2396_v13 = vmul.f32 %v5240_v7, %v4913_v48 }
 0x8aa   :  { %v3953_v26 = vpop.eup %3952  ;;  %3964 = vrcp.f32 %v2154_v31  ;;  %v2352_v52 = vsel %vm2350_vm14, %v2351_v0, %v2349_v33  ;;  %v2354_v45 = vmul.f32 %v3951_v42, %v5266_v59  ;;  %vm2362_vm7 = vcmp.eq.f32.partialorder %v5301_v23, inf }
 0x8ab   :  { %v3955_v58 = vpop.eup %3954  ;;  %v2118_v16 = vsel %vm2117_vm15, %v5238_v60, %v2116_v57  ;;  %vm2364_vm8 = vcmp.eq.f32.partialorder %v5301_v23, 0.0  ;;  %v2421_v49 = vmul.f32 %v2396_v13, %v2172_v51  ;;  %3966 = vrsqrt.f32 %v5346_v18 }
 0x8ac   :  { %v2380_v48 = vmax.f32 %v2352_v52, 1e-12  ;;  %v2121_v7 = vsel %vm2119_vm0, %v2120_v62, %v2118_v16  ;;  %v2356_v37 = vsel %vm2355_vm1, %v5266_v59, %v2354_v45  ;;  %v2123_v0 = vmul.f32 %v3955_v58, %v5273_v25 }
 0x8ad   :  { %3968 = vrcp.f32 %v2379_v44  ;;  %v2155_v43 = vmax.f32 %v2121_v7, 1e-12  ;;  %v2365_v17 = vand.u32 2147483648, %v5301_v23  ;;  %vm2131_vm9 = vcmp.eq.f32.partialorder %v5309_v38, inf  ;;  %3508 = vmatprep.mubr.msk.f32.mxu0 %vm270_vm4, %v2421_v49 }
 0x8ae   :  { %v3957_v21 = vpop.eup %3956  ;;  %v2359_v2 = vsel %vm2357_vm2, %v2358_v12, %v2356_v37  ;;  %v2125_v60 = vsel %vm2124_vm5, %v5273_v25, %v2123_v0  ;;  %v2174_v62 = vmul.f32 %v5294_v46, %v4857_v35  ;;  %v2398_v10 = vmul.f32 %v5268_v47, %v4909_v34 }
 0x8af   :  { %v3959_v24 = vpop.eup %3958  ;;  %3970 = vrcp.f32 %v2155_v43  ;;  %v2128_v50 = vsel %vm2126_vm3, %v2127_v54, %v2125_v60  ;;  %v2361_v56 = vmul.f32 %v3957_v21, %v5301_v23  ;;  %v2176_v59 = vmul.f32 %v3943_v19, %v4863_v20  ;;  %v5431_v21 = vld [vmem:[%s5479_s3 + $0x84] ss:$0 sm:$0xff] }
 0x8b0   :  { %v3961_v32 = vpop.eup %3960  ;;  %3972 = vrcp.f32 %v2380_v48  ;;  %v2156_v27 = vmax.f32 %v2128_v50, 1e-12  ;;  %v2422_v28 = vmul.f32 %v2398_v10, %v2174_v62  ;;  %v2400_v12 = vmul.f32 %v5279_v4, %v4923_v36 }
 0x8b1   :  { %v3963_v35 = vpop.eup %3962  ;;  %v2363_v34 = vsel %vm2362_vm7, %v5301_v23, %v2361_v56  ;;  %v2178_v47 = vmul.f32 %v3953_v26, %v4861_v5  ;;  %v2402_v25 = vmul.f32 %v5319_v8, %v4919_v29  ;;  %v2180_v46 = vmul.f32 %v3961_v32, %v4867_v6 }
 0x8b2   :  { %v2381_v20 = vmax.f32 %v2359_v2, 1e-12  ;;  %3974 = vrcp.f32 %v2156_v27  ;;  %v2130_v19 = vmul.f32 %v3963_v35, %v5309_v38  ;;  %3509 = vmatmul.mubr.msk.f32.gmra.mrb[40].mxu0 %vm270_vm4, %v2422_v28  ;;  %v2423_v53 = vmul.f32 %v2400_v12, %v2176_v59 }
 0x8b3   :  { %v2366_v36 = vsel %vm2364_vm8, %v2365_v17, %v2363_v34  ;;  %v2134_v4 = vand.u32 2147483648, %v5309_v38  ;;  %v2424_v63 = vmul.f32 %v2402_v25, %v2178_v47  ;;  %v2404_v5 = vmul.f32 %v5334_v9, %v4933_v61 }
 0x8b4   :  { %v3965_v3 = vpop.eup %3964  ;;  %v2132_v6 = vsel %vm2131_vm9, %v5309_v38, %v2130_v19  ;;  %vm2133_vm10 = vcmp.eq.f32.partialorder %v5309_v38, 0.0  ;;  %3511 = vmatprep.mubr.msk.f32.mxu0 %vm270_vm4, %v2423_v53  ;;  %v2406_v54 = vmul.f32 %v3959_v24, %v4929_v39  ;;  %3976 = vrcp.f32 %v2381_v20 }
 0x8b5   :  { %v3967_v29 = vpop.eup %3966  ;;  %v2135_v8 = vsel %vm2133_vm10, %v2134_v4, %v2132_v6  ;;  %v2425_v31 = vmul.f32 %v2404_v5, %v2180_v46  ;;  %v2182_v23 = vmul.f32 %v3965_v3, %v4865_v11  ;;  %v2382_v51 = vmax.f32 %v2366_v36, 1e-12 }
 0x8b6   :  { %v2157_v42 = vmax.f32 %v2135_v8, 1e-12  ;;  %v2137_v61 = vmul.f32 %v3967_v29, %v5346_v18  ;;  %3512 = vmatmul.mubr.msk.f32.gmra.mrb[42].mxu0 %vm270_vm4, %v2424_v63  ;;  %vm2138_vm11 = vcmp.eq.f32.partialorder %v5346_v18, inf  ;;  %v2141_v38 = vand.u32 2147483648, %v5346_v18 }
 0x8b7   :  { %v3969_v9 = vpop.eup %3968  ;;  %3514 = vmatprep.mubr.msk.f32.mxu0 %vm270_vm4, %v2425_v31  ;;  %v2426_v44 = vmul.f32 %v2406_v54, %v2182_v23  ;;  %vm2140_vm12 = vcmp.eq.f32.partialorder %v5346_v18, 0.0 }
 0x8b8   :  { %3978 = vrcp.f32 %v2157_v42  ;;  %v2139_v11 = vsel %vm2138_vm11, %v5346_v18, %v2137_v61  ;;  %v2408_v52 = vmul.f32 %v3969_v9, %v4943_v14 }
 0x8b9   :  { %v3971_v39 = vpop.eup %3970  ;;  %v2142_v33 = vsel %vm2140_vm12, %v2141_v38, %v2139_v11  ;;  %3980 = vrcp.f32 %v2382_v51 }
 0x8ba   :  { %v3973_v57 = vpop.eup %3972  ;;  %v2158_v13 = vmax.f32 %v2142_v33, 1e-12  ;;  %3515 = vmatmul.mubr.msk.f32.gmra.mrb[44].mxu0 %vm270_vm4, %v2426_v44  ;;  %v2184_v26 = vmul.f32 %v3971_v39, %v4871_v30 }
 0x8bb   :  { %v2410_v49 = vmul.f32 %v3973_v57, %v4939_v1 }
 0x8bc   :  { %v3975_v45 = vpop.eup %3974  ;;  %3982 = vrcp.f32 %v2158_v13  ;;  %v2427_v58 = vmul.f32 %v2408_v52, %v2184_v26 }
 0x8bd   :  { %v2186_v16 = vmul.f32 %v3975_v45, %v4869_v22 }
 0x8be   :  { %3517 = vmatprep.mubr.msk.f32.mxu0 %vm270_vm4, %v2427_v58  ;;  %v3977_v48 = vpop.eup %3976 }
 0x8bf   :  { %v2428_v18 = vmul.f32 %v2410_v49, %v2186_v16  ;;  %v2412_v30 = vmul.f32 %v3977_v48, %v4953_v15 }
 0x8c1   :  { %3518 = vmatmul.mubr.msk.f32.gmra.mrb[46].mxu0 %vm270_vm4, %v2428_v18 }
 0x8c2   :  { %v3979_v7 = vpop.eup %3978 }
 0x8c3   :  { %v2188_v37 = vmul.f32 %v3979_v7, %v4875_v55  ;;  %v3981_v0 = vpop.eup %3980 }
 0x8c4   :  { %v2414_v1 = vmul.f32 %v3981_v0, %v4949_v40  ;;  %v5492_v40 = vmov 0.0|0.0  }
 0x8c5   :  { %v2429_v14 = vmul.f32 %v2412_v30, %v2188_v37 }
 0x8c6   :  { %v3983_v43 = vpop.eup %3982 }
 0x8c7   :  { %3520 = vmatprep.mubr.msk.f32.mxu0 %vm270_vm4, %v2429_v14  ;;  %v2190_v22 = vmul.f32 %v3983_v43, %v4873_v41  ;;  %v38_v14 = vld [vmem:[%s5479_s3 + $0x85] sm:$0x1]  ;;  %v2647_v43 = vpop.permute.xlu0 %2646 }
 0x8c9   :  { %v2430_v17 = vmul.f32 %v2414_v1, %v2190_v22 }
 0x8cb   :  { %3521 = vmatmul.mubr.msk.f32.gmra.mrb[48].mxu0 %vm270_vm4, %v2430_v17 }
 0x966   :  { %v3501_v55 = vpop.f32.mrb[34].mxu0 }
 0x967   :  { %v2555_v15 = vadd.f32 %v3501_v55, %v5431_v21  ;;  %v2549_v2 = vpop.f32.mrb[35].mxu0 }
 0x968   :  { %v2550_v60 = vadd.f32 %v5431_v21, %v2549_v2 }
 0x969   :  { %v2629_v62 = vmax.f32 %v2555_v15, 0.0 }
 0x96a   :  { %v2628_v10 = vmax.f32 %v2550_v60, 0.0 }
 0x96c   :  { %v3721_v24 = vpack.c.bf16 %v2629_v62, %v2628_v10 }
 0x96e   :  { %3723 = vmatpush3.bf16.xpose.msk.msra.mxu1 %vm4140_vm6, %v3721_v24 }
 0x96f   :  { %3724 = vmatprep.subr.bf16.mxu1 %v5492_v40 }
 0x972   :  { %v3504_v50 = vpop.f32.mrb[36].mxu0 }
 0x973   :  { %v2565_v56 = vadd.f32 %v3504_v50, %v5431_v21  ;;  %v2559_v59 = vpop.f32.mrb[37].mxu0 }
 0x974   :  { %v2560_v32 = vadd.f32 %v5431_v21, %v2559_v59 }
 0x975   :  { %v2631_v27 = vmax.f32 %v2565_v56, 0.0 }
 0x976   :  { %v2630_v28 = vmax.f32 %v2560_v32, 0.0 }
 0x978   :  { %v3725_v12 = vpack.c.bf16 %v2631_v27, %v2630_v28 }
 0x97a   :  { %v3507_v35 = vpop.f32.mrb[38].mxu0  ;;  %3727 = vmatpush3.bf16.xpose.msk.msra.mxu1 %vm4140_vm6, %v3725_v12 }
 0x97b   :  { %v2575_v34 = vadd.f32 %v3507_v35, %v5431_v21  ;;  %v2569_v47 = vpop.f32.mrb[39].mxu0  ;;  %3728 = vmatprep.subr.bf16.mxu1 %v5492_v40 }
 0x97c   :  { %v2570_v25 = vadd.f32 %v5431_v21, %v2569_v47 }
 0x97d   :  { %v2633_v46 = vmax.f32 %v2575_v34, 0.0 }
 0x97e   :  { %v2632_v20 = vmax.f32 %v2570_v25, 0.0 }
 0x980   :  { %v3729_v19 = vpack.c.bf16 %v2633_v46, %v2632_v20 }
 0x982   :  { %3731 = vmatpush3.bf16.xpose.msk.msra.mxu1 %vm4140_vm6, %v3729_v19 }
 0x983   :  { %3732 = vmatprep.subr.bf16.mxu1 %v5492_v40 }
 0x985   :  { %v3510_v53 = vpop.f32.mrb[40].mxu0 }
 0x986   :  { %v2585_v36 = vadd.f32 %v3510_v53, %v5431_v21  ;;  %v2579_v4 = vpop.f32.mrb[41].mxu0 }
 0x987   :  { %v2580_v63 = vadd.f32 %v5431_v21, %v2579_v4 }
 0x988   :  { %v2635_v5 = vmax.f32 %v2585_v36, 0.0 }
 0x989   :  { %v2634_v3 = vmax.f32 %v2580_v63, 0.0  ;;  %v3513_v6 = vpop.f32.mrb[42].mxu0 }
 0x98a   :  { %v2595_v29 = vadd.f32 %v3513_v6, %v5431_v21  ;;  %v2589_v8 = vpop.f32.mrb[43].mxu0 }
 0x98b   :  { %v3733_v31 = vpack.c.bf16 %v2635_v5, %v2634_v3  ;;  %v2590_v23 = vadd.f32 %v5431_v21, %v2589_v8 }
 0x98c   :  { %v2637_v54 = vmax.f32 %v2595_v29, 0.0 }
 0x98d   :  { %3735 = vmatpush3.bf16.xpose.msk.msra.mxu1 %vm4140_vm6, %v3733_v31  ;;  %v2636_v51 = vmax.f32 %v2590_v23, 0.0  ;;  %v3516_v42 = vpop.f32.mrb[44].mxu0 }
 0x98e   :  { %3736 = vmatprep.subr.bf16.mxu1 %v5492_v40  ;;  %v2605_v61 = vadd.f32 %v3516_v42, %v5431_v21  ;;  %v2599_v9 = vpop.f32.mrb[45].mxu0 }
 0x98f   :  { %v3737_v38 = vpack.c.bf16 %v2637_v54, %v2636_v51  ;;  %v2600_v44 = vadd.f32 %v5431_v21, %v2599_v9 }
 0x990   :  { %v2639_v11 = vmax.f32 %v2605_v61, 0.0 }
 0x991   :  { %v2638_v39 = vmax.f32 %v2600_v44, 0.0 }
 0x993   :  { %v3741_v33 = vpack.c.bf16 %v2639_v11, %v2638_v39 }
 0x994   :  { %v3519_v57 = vpop.f32.mrb[46].mxu0 }
 0x995   :  { %3739 = vmatpush3.bf16.xpose.msk.msra.mxu1 %vm4140_vm6, %v3737_v38  ;;  %v2615_v13 = vadd.f32 %v3519_v57, %v5431_v21  ;;  %v2609_v26 = vpop.f32.mrb[47].mxu0 }
 0x996   :  { %3740 = vmatprep.subr.bf16.mxu1 %v5492_v40  ;;  %v2610_v52 = vadd.f32 %v5431_v21, %v2609_v26 }
 0x997   :  { %v2641_v45 = vmax.f32 %v2615_v13, 0.0 }
 0x998   :  { %v2640_v58 = vmax.f32 %v2610_v52, 0.0 }
 0x99a   :  { %v3745_v16 = vpack.c.bf16 %v2641_v45, %v2640_v58 }
 0x99d   :  { %3743 = vmatpush3.bf16.xpose.msk.msra.mxu1 %vm4140_vm6, %v3741_v33 }
 0x99e   :  { %3744 = vmatprep.subr.bf16.mxu1 %v5492_v40  ;;  %v3522_v49 = vpop.f32.mrb[48].mxu0 }
 0x99f   :  { %v2625_v18 = vadd.f32 %v3522_v49, %v5431_v21  ;;  %v2619_v48 = vpop.f32.mrb[49].mxu0 }
 0x9a0   :  { %v2620_v7 = vadd.f32 %v5431_v21, %v2619_v48 }
 0x9a1   :  { %v2643_v37 = vmax.f32 %v2625_v18, 0.0 }
 0x9a2   :  { %v2642_v30 = vmax.f32 %v2620_v7, 0.0 }
 0x9a4   :  { %v3749_v0 = vpack.c.bf16 %v2643_v37, %v2642_v30 }
 0x9a5   :  { %3747 = vmatpush3.bf16.xpose.msk.msra.mxu1 %vm4140_vm6, %v3745_v16 }
 0x9a6   :  { %3748 = vmatprep.subr.bf16.mxu1 %v5492_v40 }
 0x9ad   :  { %3751 = vmatpush3.bf16.xpose.msk.msra.mxu1 %vm4140_vm6, %v3749_v0 }
 0x9b4   :  { %3556 = vmatmul.mubr.msk.f32.vlgmr.msra.gmra.mrb[80].mxu1 %vm270_vm4, %v38_v14 }
 0xa87   :  { %v2766_v22 = vpop.f32.mrb[80].mxu1 }
 0xa88   :  { %v2767_v1 = vadd.f32 %v2766_v22, %v2647_v43  ;;  %v3557_v17 = vpop.f32.mrb[81].mxu1 }
 0xa8a   :  { %2770 = vst [vmem:[%s5483_s4] sm:$0x1] %v2767_v1 }

</bundles_post_ra>
